<compile_context>
chip_gen: v7x
topology: tpu7x:2x2x1
jax: 0.10.0
libtpu: 0.0.40
codegen_flags: <defaults>
</compile_context>

<pallas_src>
import functools

import jax
import jax.numpy as jnp
from jax import lax
from jax.experimental import pallas as pl
from jax.experimental.pallas import tpu as pltpu


def _round_up(n, m):
    return ((n + m - 1) // m) * m


# ---------------------------------------------------------------------------
# Kernel
# ---------------------------------------------------------------------------

def _rnn_kernel(x_ref, wih0_ref, wihr_ref, whh_ref, bias_ref,
                wfc1_ref, bfc1_ref, wfc2_ref, bfc2_ref,
                out_ref, seq_ref, *, proj_chunk_t, unroll):
    """One batch block of the full forward pass.

    x_ref   : (T, TB, I)           time-major input block
    wih0_ref: (I, Hp)              layer-0 W_ih^T, cols zero-padded to Hp
    wihr_ref: (max(L-1,1), Hp, Hp) layers 1..L-1 W_ih^T (dummy zeros if L == 1)
    whh_ref : (L, Hp, Hp)          W_hh^T, zero-padded
    bias_ref: (L, 1, Hp)           combined b_ih + b_hh, zero-padded
    wfc1_ref: (Hp, Hp), bfc1_ref: (1, Hp)
    wfc2_ref: (Hp, Op), bfc2_ref: (1, Op)
    out_ref : (Lo, TB, Op)
    seq_ref : (T, TB, Hp)          VMEM scratch, current layer's hidden sequence
    """
    T, TB, Hp = seq_ref.shape
    L = whh_ref.shape[0]
    Lo = out_ref.shape[0]
    Op = out_ref.shape[2]

    for l in range(L):                       # num_layers is static -> unrolled
        bias = bias_ref[l]                   # (1, Hp)

        # ---- hoisted input projection, chunked over time (bounded transient,
        #      in-place overwrite is legal: each chunk reads/writes only its rows) ----
        for t0 in range(0, T, proj_chunk_t):
            ct = min(proj_chunk_t, T - t0)
            if l == 0:
                blk = x_ref[pl.ds(t0, ct)]                     # (ct, TB, I)
                w_in = wih0_ref[...]
            else:
                blk = seq_ref[pl.ds(t0, ct)]                   # (ct, TB, Hp)
                w_in = wihr_ref[l - 1]
            blk2 = blk.reshape(ct * TB, blk.shape[-1])
            proj = jnp.dot(blk2, w_in,
                           preferred_element_type=jnp.float32) + bias
            seq_ref[pl.ds(t0, ct)] = proj.reshape(ct, TB, Hp)

        # ---- serial recurrence: only the Hp x Hp matmul + tanh on the chain ----
        w_hh = whh_ref[l]                                      # (Hp, Hp)

        # t = 0: initial hidden state is zero -> h @ W_hh == 0, skip the matmul.
        h0 = jnp.tanh(seq_ref[0])
        seq_ref[0] = h0

        def step(t, h, w_hh=w_hh):
            p_t = seq_ref[t]                                   # (TB, Hp)
            h_new = jnp.tanh(
                p_t + jnp.dot(h, w_hh, preferred_element_type=jnp.float32))
            seq_ref[t] = h_new
            return h_new

        lax.fori_loop(1, T, step, h0, unroll=unroll)

    # ---- batched head: fc1 -> ReLU -> fc2 on the last Lo timesteps in one slab ----
    last = seq_ref[pl.ds(T - Lo, Lo)].reshape(Lo * TB, Hp)
    y = jnp.dot(last, wfc1_ref[...], preferred_element_type=jnp.float32) + bfc1_ref[...]
    y = jnp.maximum(y, 0.0)
    o = jnp.dot(y, wfc2_ref[...], preferred_element_type=jnp.float32) + bfc2_ref[...]
    out_ref[...] = o.reshape(Lo, TB, Op)


# ---------------------------------------------------------------------------
# Parameters (torch convention) + host-side preparation for the kernel
# ---------------------------------------------------------------------------

def init_params(key, input_size, hidden_size, num_layers, output_size):
    """Torch-convention parameters (W: (out_features, in_features)), deterministic init."""
    ks = jax.random.split(key, 4 * num_layers + 4)
    bound = 1.0 / jnp.sqrt(hidden_size)

    w_ih, w_hh, b_ih, b_hh = [], [], [], []
    for l in range(num_layers):
        in_dim = input_size if l == 0 else hidden_size
        w_ih.append(jax.random.uniform(ks[4 * l + 0], (hidden_size, in_dim),
                                       minval=-bound, maxval=bound, dtype=jnp.float32))
        w_hh.append(jax.random.uniform(ks[4 * l + 1], (hidden_size, hidden_size),
                                       minval=-bound, maxval=bound, dtype=jnp.float32))
        b_ih.append(jax.random.uniform(ks[4 * l + 2], (hidden_size,),
                                       minval=-bound, maxval=bound, dtype=jnp.float32))
        b_hh.append(jax.random.uniform(ks[4 * l + 3], (hidden_size,),
                                       minval=-bound, maxval=bound, dtype=jnp.float32))

    w_fc1 = jax.random.uniform(ks[-4], (hidden_size, hidden_size),
                               minval=-bound, maxval=bound, dtype=jnp.float32)
    b_fc1 = jax.random.uniform(ks[-3], (hidden_size,),
                               minval=-bound, maxval=bound, dtype=jnp.float32)
    w_fc2 = jax.random.uniform(ks[-2], (output_size, hidden_size),
                               minval=-bound, maxval=bound, dtype=jnp.float32)
    b_fc2 = jax.random.uniform(ks[-1], (output_size,),
                               minval=-bound, maxval=bound, dtype=jnp.float32)

    return dict(w_ih=w_ih, w_hh=w_hh, b_ih=b_ih, b_hh=b_hh,
                w_fc1=w_fc1, b_fc1=b_fc1, w_fc2=w_fc2, b_fc2=b_fc2)


def prepare_kernel_params(p):
    """Pre-transpose, combine biases and zero-pad feature dims to 128-lane multiples."""
    L = len(p["w_ih"])
    H = p["w_hh"][0].shape[0]
    I = p["w_ih"][0].shape[1]
    O = p["w_fc2"].shape[0]
    Hp = _round_up(H, 128)
    Op = _round_up(O, 128)

    def pad2(a, r, c):
        return jnp.zeros((r, c), jnp.float32).at[:a.shape[0], :a.shape[1]].set(a)

    w_ih0_t = pad2(p["w_ih"][0].T, I, Hp)                                   # (I, Hp)
    if L > 1:
        w_ihr_t = jnp.stack([pad2(w.T, Hp, Hp) for w in p["w_ih"][1:]])     # (L-1, Hp, Hp)
    else:
        w_ihr_t = jnp.zeros((1, Hp, Hp), jnp.float32)                       # unused dummy
    w_hh_t = jnp.stack([pad2(w.T, Hp, Hp) for w in p["w_hh"]])              # (L, Hp, Hp)
    bias = jnp.stack([pad2((p["b_ih"][l] + p["b_hh"][l]).reshape(1, H), 1, Hp)
                      for l in range(L)])                                   # (L, 1, Hp)
    return dict(
        w_ih0_t=w_ih0_t, w_ihr_t=w_ihr_t, w_hh_t=w_hh_t, bias=bias,
        w_fc1_t=pad2(p["w_fc1"].T, Hp, Hp),
        b_fc1=pad2(p["b_fc1"].reshape(1, H), 1, Hp),
        w_fc2_t=pad2(p["w_fc2"].T, Hp, Op),
        b_fc2=pad2(p["b_fc2"].reshape(1, O), 1, Op),
    )


# ---------------------------------------------------------------------------
# Wrapper
# ---------------------------------------------------------------------------

@functools.partial(jax.jit, static_argnames=("output_length", "output_size"))
def rnn_model_forward(x, kparams, *, output_length=1, output_size=None):
    """x: (B, T, input_size) batch-first, returns (B, output_length, output_size)."""
    B, T, I = x.shape
    L, Hp, _ = kparams["w_hh_t"].shape
    Op = kparams["w_fc2_t"].shape[1]
    O = output_size if output_size is not None else Op
    Lo = output_length
    assert 1 <= Lo <= T, "output_length must be in [1, seq_len]"

    # --- VMEM budget: ~80% of physical capacity, fallback 64 MiB ---
    try:
        vmem_cap = int(pltpu.get_tpu_info().vmem_capacity_bytes)
    except Exception:
        vmem_cap = 64 * 2**20
    budget = int(0.8 * vmem_cap)

    weight_bytes = 4 * sum(int(v.size) for v in jax.tree_util.tree_leaves(kparams))

    def chunk_t(tb):
        # ~2 MiB per projection chunk
        return max(1, min(T, (2 * 2**20) // max(1, 4 * tb * Hp)))

    def block_bytes(tb, ct):
        return 4 * (2 * T * tb * I          # x block, double buffered
                    + T * tb * Hp           # hidden-sequence scratch
                    + 2 * Lo * tb * Op      # output block, double buffered
                    + 2 * ct * tb * Hp)     # projection chunk transient (in + out)

    # --- batch tile selection: multiple of 8, capped at 128 and by VMEM budget ---
    Bp8 = _round_up(B, 8)
    TB = max(8, (min(128, Bp8) // 8) * 8)
    while TB > 8 and weight_bytes + block_bytes(TB, chunk_t(TB)) > int(0.6 * budget):
        TB = max(8, ((TB // 2) // 8) * 8)
    Bp = _round_up(B, TB)
    nb = Bp // TB
    CT = chunk_t(TB)
    unroll = max(1, (T - 1) if T <= 17 else 8)

    # --- glue: time-major, batch-padded ---
    xt = jnp.transpose(x.astype(jnp.float32), (1, 0, 2))                    # (T, B, I)
    x_pad = jnp.zeros((T, Bp, I), jnp.float32).at[:, :B, :].set(xt)

    vmem_limit = int(min(budget,
                         max(2 * (weight_bytes + block_bytes(TB, CT)) + (1 << 20),
                             16 * 2**20)))

    flops = 2 * (T * Bp * I * Hp
                 + max(L - 1, 0) * T * Bp * Hp * Hp                         # layer>0 proj
                 + L * T * Bp * Hp * Hp                                     # recurrence
                 + Lo * Bp * (Hp * Hp + Hp * Op))                           # head
    cost = pl.CostEstimate(
        flops=int(flops),
        transcendentals=int(L * T * Bp * Hp),
        bytes_accessed=int(4 * (T * Bp * I + Lo * Bp * Op) + weight_bytes))

    def _const_map(ndim):
        def im(b):
            return (0,) * ndim
        return im

    w_args = [kparams["w_ih0_t"], kparams["w_ihr_t"], kparams["w_hh_t"],
              kparams["bias"], kparams["w_fc1_t"], kparams["b_fc1"],
              kparams["w_fc2_t"], kparams["b_fc2"]]
    w_specs = [pl.BlockSpec(a.shape, _const_map(a.ndim)) for a in w_args]

    kernel = functools.partial(_rnn_kernel, proj_chunk_t=CT, unroll=unroll)

    out = pl.pallas_call(
        kernel,
        out_shape=jax.ShapeDtypeStruct((Lo, Bp, Op), jnp.float32),
        grid=(nb,),
        in_specs=[pl.BlockSpec((T, TB, I), lambda b: (0, b, 0))] + w_specs,
        out_specs=pl.BlockSpec((Lo, TB, Op), lambda b: (0, b, 0)),
        scratch_shapes=[pltpu.VMEM((T, TB, Hp), jnp.float32)],
        compiler_params=pltpu.CompilerParams(
            dimension_semantics=("parallel",),
            vmem_limit_bytes=vmem_limit),
        cost_estimate=cost,
    )(x_pad, *w_args)

    out = out[:, :B, :O]                          # drop batch / lane padding
    return jnp.transpose(out, (1, 0, 2))          # (B, Lo, O)


# ---------------------------------------------------------------------------
# Pure-JAX reference (torch semantics) for verification
# ---------------------------------------------------------------------------

def rnn_model_reference(x, p, *, output_length=1):
    B, T, I = x.shape
    L = len(p["w_ih"])
    H = p["w_hh"][0].shape[0]
    seq = jnp.transpose(x.astype(jnp.float32), (1, 0, 2))                   # (T, B, I)
    for l in range(L):
        h = jnp.zeros((B, H), jnp.float32)
        outs = []
        for t in range(T):
            h = jnp.tanh(seq[t] @ p["w_ih"][l].T + p["b_ih"][l]
                         + h @ p["w_hh"][l].T + p["b_hh"][l])
            outs.append(h)
        seq = jnp.stack(outs)                                               # (T, B, H)
    last = jnp.transpose(seq[T - output_length:], (1, 0, 2))                # (B, Lo, H)
    y = jnp.maximum(last @ p["w_fc1"].T + p["b_fc1"], 0.0)
    return y @ p["w_fc2"].T + p["b_fc2"]


if __name__ == "__main__":
    # small, module-consistent shapes
    batch, seq_len = 2, 8
    input_size, hidden_size, num_layers = 4, 32, 2
    output_size, output_length = 4, 1

    key = jax.random.PRNGKey(0)
    kx, kp = jax.random.split(key)
    x = jax.random.normal(kx, (batch, seq_len, input_size), dtype=jnp.float32)

    torch_params = init_params(kp, input_size, hidden_size, num_layers, output_size)
    kernel_params = prepare_kernel_params(torch_params)

    out = rnn_model_forward(x, kernel_params, output_length=output_length,
                            output_size=output_size)
    out = jax.block_until_ready(out)

    ref = rnn_model_reference(x, torch_params, output_length=output_length)
    assert out.shape == (batch, output_length, output_size)
    assert jnp.allclose(out, ref, atol=1e-4, rtol=1e-4), "mismatch vs reference"

    print("KERNEL_OK")
</pallas_src>

<mosaic_0001>
module attributes {stable_mosaic.version = 11 : i64} {
  func.func @_rnn_kernel(%arg0: i32, %arg1: memref<8x8x4xf32, #tpu.memory_space<vmem>>, %arg2: memref<4x128xf32, #tpu.memory_space<vmem>>, %arg3: memref<1x128x128xf32, #tpu.memory_space<vmem>>, %arg4: memref<2x128x128xf32, #tpu.memory_space<vmem>>, %arg5: memref<2x1x128xf32, #tpu.memory_space<vmem>>, %arg6: memref<128x128xf32, #tpu.memory_space<vmem>>, %arg7: memref<1x128xf32, #tpu.memory_space<vmem>>, %arg8: memref<128x128xf32, #tpu.memory_space<vmem>>, %arg9: memref<1x128xf32, #tpu.memory_space<vmem>>, %arg10: memref<1x8x128xf32, #tpu.memory_space<vmem>>, %arg11: memref<8x8x128xf32, #tpu.memory_space<vmem>>) attributes {dimension_semantics = [#tpu.dimension_semantics<parallel>], iteration_bounds = array<i64: 1>, scalar_prefetch = 0 : i64, scratch_operands = 1 : i64, tpu.core_type = #tpu.core_type<tc>, window_params = [{transform_indices = @transform_0, window_bounds = array<i64: 8, 8, 4>}, {pipeline_mode = #tpu.pipeline_mode<synchronous>, transform_indices = @transform_1, window_bounds = array<i64: 4, 128>}, {pipeline_mode = #tpu.pipeline_mode<synchronous>, transform_indices = @transform_2, window_bounds = array<i64: 1, 128, 128>}, {pipeline_mode = #tpu.pipeline_mode<synchronous>, transform_indices = @transform_3, window_bounds = array<i64: 2, 128, 128>}, {pipeline_mode = #tpu.pipeline_mode<synchronous>, transform_indices = @transform_4, window_bounds = array<i64: 2, 1, 128>}, {pipeline_mode = #tpu.pipeline_mode<synchronous>, transform_indices = @transform_5, window_bounds = array<i64: 128, 128>}, {pipeline_mode = #tpu.pipeline_mode<synchronous>, transform_indices = @transform_6, window_bounds = array<i64: 1, 128>}, {pipeline_mode = #tpu.pipeline_mode<synchronous>, transform_indices = @transform_7, window_bounds = array<i64: 128, 128>}, {pipeline_mode = #tpu.pipeline_mode<synchronous>, transform_indices = @transform_8, window_bounds = array<i64: 1, 128>}, {transform_indices = @transform_9, window_bounds = array<i64: 1, 8, 128>}]} {
    %c0 = arith.constant 0 : index
    %c0_0 = arith.constant 0 : index
    %c0_1 = arith.constant 0 : index
    %0 = vector.load %arg5[%c0, %c0_0, %c0_1] : memref<2x1x128xf32, #tpu.memory_space<vmem>>, vector<1x1x128xf32>
    %1 = vector.shape_cast %0 : vector<1x1x128xf32> to vector<1x128xf32>
    %c0_2 = arith.constant 0 : index
    %c0_3 = arith.constant 0 : index
    %c0_4 = arith.constant 0 : index
    %2 = vector.load %arg1[%c0_2, %c0_3, %c0_4] : memref<8x8x4xf32, #tpu.memory_space<vmem>>, vector<8x8x4xf32>
    %c0_5 = arith.constant 0 : index
    %c0_6 = arith.constant 0 : index
    %3 = vector.load %arg2[%c0_5, %c0_6] : memref<4x128xf32, #tpu.memory_space<vmem>>, vector<4x128xf32>
    %4 = vector.shape_cast %2 : vector<8x8x4xf32> to vector<64x4xf32>
    %cst = arith.constant dense<0.000000e+00> : vector<64x128xf32>
    %5 = tpu.matmul %4, %3, %cst {dimension_numbers = #tpu.dot_dimension_numbers<[1], [0], [0], [1], [0, 0, 1, 1], [], []>} : vector<64x4xf32>, vector<4x128xf32>, vector<64x128xf32> -> vector<64x128xf32>
    %6 = vector.broadcast %1 : vector<1x128xf32> to vector<64x128xf32>
    %7 = arith.addf %5, %6 : vector<64x128xf32>
    %8 = vector.shape_cast %7 : vector<64x128xf32> to vector<8x8x128xf32>
    %c0_7 = arith.constant 0 : index
    %c0_8 = arith.constant 0 : index
    %c0_9 = arith.constant 0 : index
    %9 = vector.load %arg11[%c0_7, %c0_8, %c0_9] : memref<8x8x128xf32, #tpu.memory_space<vmem>>, vector<8x8x128xf32>
    tpu.vector_store %arg11[%c0_7, %c0_8, %c0_9], %8 {strides = array<i32>} : memref<8x8x128xf32, #tpu.memory_space<vmem>>, vector<8x8x128xf32>,
    %c0_10 = arith.constant 0 : index
    %c0_11 = arith.constant 0 : index
    %c0_12 = arith.constant 0 : index
    %10 = vector.load %arg4[%c0_10, %c0_11, %c0_12] : memref<2x128x128xf32, #tpu.memory_space<vmem>>, vector<1x128x128xf32>
    %11 = vector.shape_cast %10 : vector<1x128x128xf32> to vector<128x128xf32>
    %c0_13 = arith.constant 0 : index
    %c0_14 = arith.constant 0 : index
    %c0_15 = arith.constant 0 : index
    %12 = vector.load %arg11[%c0_13, %c0_14, %c0_15] : memref<8x8x128xf32, #tpu.memory_space<vmem>>, vector<1x8x128xf32>
    %13 = vector.shape_cast %12 : vector<1x8x128xf32> to vector<8x128xf32>
    %14 = math.tanh %13 : vector<8x128xf32>
    %c0_16 = arith.constant 0 : index
    %c0_17 = arith.constant 0 : index
    %c0_18 = arith.constant 0 : index
    %15 = vector.load %arg11[%c0_16, %c0_17, %c0_18] : memref<8x8x128xf32, #tpu.memory_space<vmem>>, vector<1x8x128xf32>
    %16 = vector.shape_cast %15 : vector<1x8x128xf32> to vector<8x128xf32>
    %17 = vector.shape_cast %14 : vector<8x128xf32> to vector<1x8x128xf32>
    tpu.vector_store %arg11[%c0_16, %c0_17, %c0_18], %17 {strides = array<i32>} : memref<8x8x128xf32, #tpu.memory_space<vmem>>, vector<1x8x128xf32>,
    %c1_i32 = arith.constant 1 : i32
    %18 = arith.index_cast %c1_i32 : i32 to index
    %c0_19 = arith.constant 0 : index
    %c0_20 = arith.constant 0 : index
    %19 = vector.load %arg11[%18, %c0_19, %c0_20] : memref<8x8x128xf32, #tpu.memory_space<vmem>>, vector<1x8x128xf32>
    %20 = vector.shape_cast %19 : vector<1x8x128xf32> to vector<8x128xf32>
    %cst_21 = arith.constant dense<0.000000e+00> : vector<8x128xf32>
    %21 = tpu.matmul %14, %11, %cst_21 {dimension_numbers = #tpu.dot_dimension_numbers<[1], [0], [0], [1], [0, 0, 1, 1], [], []>} : vector<8x128xf32>, vector<128x128xf32>, vector<8x128xf32> -> vector<8x128xf32>
    %22 = arith.addf %20, %21 : vector<8x128xf32>
    %23 = math.tanh %22 : vector<8x128xf32>
    %24 = arith.index_cast %c1_i32 : i32 to index
    %c0_22 = arith.constant 0 : index
    %c0_23 = arith.constant 0 : index
    %25 = vector.load %arg11[%24, %c0_22, %c0_23] : memref<8x8x128xf32, #tpu.memory_space<vmem>>, vector<1x8x128xf32>
    %26 = vector.shape_cast %25 : vector<1x8x128xf32> to vector<8x128xf32>
    %27 = vector.shape_cast %23 : vector<8x128xf32> to vector<1x8x128xf32>
    tpu.vector_store %arg11[%24, %c0_22, %c0_23], %27 {strides = array<i32>} : memref<8x8x128xf32, #tpu.memory_space<vmem>>, vector<1x8x128xf32>,
    %c2_i32 = arith.constant 2 : i32
    %28 = arith.index_cast %c2_i32 : i32 to index
    %c0_24 = arith.constant 0 : index
    %c0_25 = arith.constant 0 : index
    %29 = vector.load %arg11[%28, %c0_24, %c0_25] : memref<8x8x128xf32, #tpu.memory_space<vmem>>, vector<1x8x128xf32>
    %30 = vector.shape_cast %29 : vector<1x8x128xf32> to vector<8x128xf32>
    %cst_26 = arith.constant dense<0.000000e+00> : vector<8x128xf32>
    %31 = tpu.matmul %23, %11, %cst_26 {dimension_numbers = #tpu.dot_dimension_numbers<[1], [0], [0], [1], [0, 0, 1, 1], [], []>} : vector<8x128xf32>, vector<128x128xf32>, vector<8x128xf32> -> vector<8x128xf32>
    %32 = arith.addf %30, %31 : vector<8x128xf32>
    %33 = math.tanh %32 : vector<8x128xf32>
    %34 = arith.index_cast %c2_i32 : i32 to index
    %c0_27 = arith.constant 0 : index
    %c0_28 = arith.constant 0 : index
    %35 = vector.load %arg11[%34, %c0_27, %c0_28] : memref<8x8x128xf32, #tpu.memory_space<vmem>>, vector<1x8x128xf32>
    %36 = vector.shape_cast %35 : vector<1x8x128xf32> to vector<8x128xf32>
    %37 = vector.shape_cast %33 : vector<8x128xf32> to vector<1x8x128xf32>
    tpu.vector_store %arg11[%34, %c0_27, %c0_28], %37 {strides = array<i32>} : memref<8x8x128xf32, #tpu.memory_space<vmem>>, vector<1x8x128xf32>,
    %c3_i32 = arith.constant 3 : i32
    %38 = arith.index_cast %c3_i32 : i32 to index
    %c0_29 = arith.constant 0 : index
    %c0_30 = arith.constant 0 : index
    %39 = vector.load %arg11[%38, %c0_29, %c0_30] : memref<8x8x128xf32, #tpu.memory_space<vmem>>, vector<1x8x128xf32>
    %40 = vector.shape_cast %39 : vector<1x8x128xf32> to vector<8x128xf32>
    %cst_31 = arith.constant dense<0.000000e+00> : vector<8x128xf32>
    %41 = tpu.matmul %33, %11, %cst_31 {dimension_numbers = #tpu.dot_dimension_numbers<[1], [0], [0], [1], [0, 0, 1, 1], [], []>} : vector<8x128xf32>, vector<128x128xf32>, vector<8x128xf32> -> vector<8x128xf32>
    %42 = arith.addf %40, %41 : vector<8x128xf32>
    %43 = math.tanh %42 : vector<8x128xf32>
    %44 = arith.index_cast %c3_i32 : i32 to index
    %c0_32 = arith.constant 0 : index
    %c0_33 = arith.constant 0 : index
    %45 = vector.load %arg11[%44, %c0_32, %c0_33] : memref<8x8x128xf32, #tpu.memory_space<vmem>>, vector<1x8x128xf32>
    %46 = vector.shape_cast %45 : vector<1x8x128xf32> to vector<8x128xf32>
    %47 = vector.shape_cast %43 : vector<8x128xf32> to vector<1x8x128xf32>
    tpu.vector_store %arg11[%44, %c0_32, %c0_33], %47 {strides = array<i32>} : memref<8x8x128xf32, #tpu.memory_space<vmem>>, vector<1x8x128xf32>,
    %c4_i32 = arith.constant 4 : i32
    %48 = arith.index_cast %c4_i32 : i32 to index
    %c0_34 = arith.constant 0 : index
    %c0_35 = arith.constant 0 : index
    %49 = vector.load %arg11[%48, %c0_34, %c0_35] : memref<8x8x128xf32, #tpu.memory_space<vmem>>, vector<1x8x128xf32>
    %50 = vector.shape_cast %49 : vector<1x8x128xf32> to vector<8x128xf32>
    %cst_36 = arith.constant dense<0.000000e+00> : vector<8x128xf32>
    %51 = tpu.matmul %43, %11, %cst_36 {dimension_numbers = #tpu.dot_dimension_numbers<[1], [0], [0], [1], [0, 0, 1, 1], [], []>} : vector<8x128xf32>, vector<128x128xf32>, vector<8x128xf32> -> vector<8x128xf32>
    %52 = arith.addf %50, %51 : vector<8x128xf32>
    %53 = math.tanh %52 : vector<8x128xf32>
    %54 = arith.index_cast %c4_i32 : i32 to index
    %c0_37 = arith.constant 0 : index
    %c0_38 = arith.constant 0 : index
    %55 = vector.load %arg11[%54, %c0_37, %c0_38] : memref<8x8x128xf32, #tpu.memory_space<vmem>>, vector<1x8x128xf32>
    %56 = vector.shape_cast %55 : vector<1x8x128xf32> to vector<8x128xf32>
    %57 = vector.shape_cast %53 : vector<8x128xf32> to vector<1x8x128xf32>
    tpu.vector_store %arg11[%54, %c0_37, %c0_38], %57 {strides = array<i32>} : memref<8x8x128xf32, #tpu.memory_space<vmem>>, vector<1x8x128xf32>,
    %c5_i32 = arith.constant 5 : i32
    %58 = arith.index_cast %c5_i32 : i32 to index
    %c0_39 = arith.constant 0 : index
    %c0_40 = arith.constant 0 : index
    %59 = vector.load %arg11[%58, %c0_39, %c0_40] : memref<8x8x128xf32, #tpu.memory_space<vmem>>, vector<1x8x128xf32>
    %60 = vector.shape_cast %59 : vector<1x8x128xf32> to vector<8x128xf32>
    %cst_41 = arith.constant dense<0.000000e+00> : vector<8x128xf32>
    %61 = tpu.matmul %53, %11, %cst_41 {dimension_numbers = #tpu.dot_dimension_numbers<[1], [0], [0], [1], [0, 0, 1, 1], [], []>} : vector<8x128xf32>, vector<128x128xf32>, vector<8x128xf32> -> vector<8x128xf32>
    %62 = arith.addf %60, %61 : vector<8x128xf32>
    %63 = math.tanh %62 : vector<8x128xf32>
    %64 = arith.index_cast %c5_i32 : i32 to index
    %c0_42 = arith.constant 0 : index
    %c0_43 = arith.constant 0 : index
    %65 = vector.load %arg11[%64, %c0_42, %c0_43] : memref<8x8x128xf32, #tpu.memory_space<vmem>>, vector<1x8x128xf32>
    %66 = vector.shape_cast %65 : vector<1x8x128xf32> to vector<8x128xf32>
    %67 = vector.shape_cast %63 : vector<8x128xf32> to vector<1x8x128xf32>
    tpu.vector_store %arg11[%64, %c0_42, %c0_43], %67 {strides = array<i32>} : memref<8x8x128xf32, #tpu.memory_space<vmem>>, vector<1x8x128xf32>,
    %c6_i32 = arith.constant 6 : i32
    %68 = arith.index_cast %c6_i32 : i32 to index
    %c0_44 = arith.constant 0 : index
    %c0_45 = arith.constant 0 : index
    %69 = vector.load %arg11[%68, %c0_44, %c0_45] : memref<8x8x128xf32, #tpu.memory_space<vmem>>, vector<1x8x128xf32>
    %70 = vector.shape_cast %69 : vector<1x8x128xf32> to vector<8x128xf32>
    %cst_46 = arith.constant dense<0.000000e+00> : vector<8x128xf32>
    %71 = tpu.matmul %63, %11, %cst_46 {dimension_numbers = #tpu.dot_dimension_numbers<[1], [0], [0], [1], [0, 0, 1, 1], [], []>} : vector<8x128xf32>, vector<128x128xf32>, vector<8x128xf32> -> vector<8x128xf32>
    %72 = arith.addf %70, %71 : vector<8x128xf32>
    %73 = math.tanh %72 : vector<8x128xf32>
    %74 = arith.index_cast %c6_i32 : i32 to index
    %c0_47 = arith.constant 0 : index
    %c0_48 = arith.constant 0 : index
    %75 = vector.load %arg11[%74, %c0_47, %c0_48] : memref<8x8x128xf32, #tpu.memory_space<vmem>>, vector<1x8x128xf32>
    %76 = vector.shape_cast %75 : vector<1x8x128xf32> to vector<8x128xf32>
    %77 = vector.shape_cast %73 : vector<8x128xf32> to vector<1x8x128xf32>
    tpu.vector_store %arg11[%74, %c0_47, %c0_48], %77 {strides = array<i32>} : memref<8x8x128xf32, #tpu.memory_space<vmem>>, vector<1x8x128xf32>,
    %c7_i32 = arith.constant 7 : i32
    %78 = arith.index_cast %c7_i32 : i32 to index
    %c0_49 = arith.constant 0 : index
    %c0_50 = arith.constant 0 : index
    %79 = vector.load %arg11[%78, %c0_49, %c0_50] : memref<8x8x128xf32, #tpu.memory_space<vmem>>, vector<1x8x128xf32>
    %80 = vector.shape_cast %79 : vector<1x8x128xf32> to vector<8x128xf32>
    %cst_51 = arith.constant dense<0.000000e+00> : vector<8x128xf32>
    %81 = tpu.matmul %73, %11, %cst_51 {dimension_numbers = #tpu.dot_dimension_numbers<[1], [0], [0], [1], [0, 0, 1, 1], [], []>} : vector<8x128xf32>, vector<128x128xf32>, vector<8x128xf32> -> vector<8x128xf32>
    %82 = arith.addf %80, %81 : vector<8x128xf32>
    %83 = math.tanh %82 : vector<8x128xf32>
    %84 = arith.index_cast %c7_i32 : i32 to index
    %c0_52 = arith.constant 0 : index
    %c0_53 = arith.constant 0 : index
    %85 = vector.load %arg11[%84, %c0_52, %c0_53] : memref<8x8x128xf32, #tpu.memory_space<vmem>>, vector<1x8x128xf32>
    %86 = vector.shape_cast %85 : vector<1x8x128xf32> to vector<8x128xf32>
    %87 = vector.shape_cast %83 : vector<8x128xf32> to vector<1x8x128xf32>
    tpu.vector_store %arg11[%84, %c0_52, %c0_53], %87 {strides = array<i32>} : memref<8x8x128xf32, #tpu.memory_space<vmem>>, vector<1x8x128xf32>,
    %c7_i32_54 = arith.constant 7 : i32
    %c1 = arith.constant 1 : index
    %c0_55 = arith.constant 0 : index
    %c0_56 = arith.constant 0 : index
    %88 = vector.load %arg5[%c1, %c0_55, %c0_56] : memref<2x1x128xf32, #tpu.memory_space<vmem>>, vector<1x1x128xf32>
    %89 = vector.shape_cast %88 : vector<1x1x128xf32> to vector<1x128xf32>
    %c0_57 = arith.constant 0 : index
    %c0_58 = arith.constant 0 : index
    %c0_59 = arith.constant 0 : index
    %90 = vector.load %arg11[%c0_57, %c0_58, %c0_59] : memref<8x8x128xf32, #tpu.memory_space<vmem>>, vector<8x8x128xf32>
    %c0_60 = arith.constant 0 : index
    %c0_61 = arith.constant 0 : index
    %c0_62 = arith.constant 0 : index
    %91 = vector.load %arg3[%c0_60, %c0_61, %c0_62] : memref<1x128x128xf32, #tpu.memory_space<vmem>>, vector<1x128x128xf32>
    %92 = vector.shape_cast %91 : vector<1x128x128xf32> to vector<128x128xf32>
    %93 = vector.shape_cast %90 : vector<8x8x128xf32> to vector<64x128xf32>
    %cst_63 = arith.constant dense<0.000000e+00> : vector<64x128xf32>
    %94 = tpu.matmul %93, %92, %cst_63 {dimension_numbers = #tpu.dot_dimension_numbers<[1], [0], [0], [1], [0, 0, 1, 1], [], []>} : vector<64x128xf32>, vector<128x128xf32>, vector<64x128xf32> -> vector<64x128xf32>
    %95 = vector.broadcast %89 : vector<1x128xf32> to vector<64x128xf32>
    %96 = arith.addf %94, %95 : vector<64x128xf32>
    %97 = vector.shape_cast %96 : vector<64x128xf32> to vector<8x8x128xf32>
    %c0_64 = arith.constant 0 : index
    %c0_65 = arith.constant 0 : index
    %c0_66 = arith.constant 0 : index
    %98 = vector.load %arg11[%c0_64, %c0_65, %c0_66] : memref<8x8x128xf32, #tpu.memory_space<vmem>>, vector<8x8x128xf32>
    tpu.vector_store %arg11[%c0_64, %c0_65, %c0_66], %97 {strides = array<i32>} : memref<8x8x128xf32, #tpu.memory_space<vmem>>, vector<8x8x128xf32>,
    %c1_67 = arith.constant 1 : index
    %c0_68 = arith.constant 0 : index
    %c0_69 = arith.constant 0 : index
    %99 = vector.load %arg4[%c1_67, %c0_68, %c0_69] : memref<2x128x128xf32, #tpu.memory_space<vmem>>, vector<1x128x128xf32>
    %100 = vector.shape_cast %99 : vector<1x128x128xf32> to vector<128x128xf32>
    %c0_70 = arith.constant 0 : index
    %c0_71 = arith.constant 0 : index
    %c0_72 = arith.constant 0 : index
    %101 = vector.load %arg11[%c0_70, %c0_71, %c0_72] : memref<8x8x128xf32, #tpu.memory_space<vmem>>, vector<1x8x128xf32>
    %102 = vector.shape_cast %101 : vector<1x8x128xf32> to vector<8x128xf32>
    %103 = math.tanh %102 : vector<8x128xf32>
    %c0_73 = arith.constant 0 : index
    %c0_74 = arith.constant 0 : index
    %c0_75 = arith.constant 0 : index
    %104 = vector.load %arg11[%c0_73, %c0_74, %c0_75] : memref<8x8x128xf32, #tpu.memory_space<vmem>>, vector<1x8x128xf32>
    %105 = vector.shape_cast %104 : vector<1x8x128xf32> to vector<8x128xf32>
    %106 = vector.shape_cast %103 : vector<8x128xf32> to vector<1x8x128xf32>
    tpu.vector_store %arg11[%c0_73, %c0_74, %c0_75], %106 {strides = array<i32>} : memref<8x8x128xf32, #tpu.memory_space<vmem>>, vector<1x8x128xf32>,
    %c1_i32_76 = arith.constant 1 : i32
    %107 = arith.index_cast %c1_i32_76 : i32 to index
    %c0_77 = arith.constant 0 : index
    %c0_78 = arith.constant 0 : index
    %108 = vector.load %arg11[%107, %c0_77, %c0_78] : memref<8x8x128xf32, #tpu.memory_space<vmem>>, vector<1x8x128xf32>
    %109 = vector.shape_cast %108 : vector<1x8x128xf32> to vector<8x128xf32>
    %cst_79 = arith.constant dense<0.000000e+00> : vector<8x128xf32>
    %110 = tpu.matmul %103, %100, %cst_79 {dimension_numbers = #tpu.dot_dimension_numbers<[1], [0], [0], [1], [0, 0, 1, 1], [], []>} : vector<8x128xf32>, vector<128x128xf32>, vector<8x128xf32> -> vector<8x128xf32>
    %111 = arith.addf %109, %110 : vector<8x128xf32>
    %112 = math.tanh %111 : vector<8x128xf32>
    %113 = arith.index_cast %c1_i32_76 : i32 to index
    %c0_80 = arith.constant 0 : index
    %c0_81 = arith.constant 0 : index
    %114 = vector.load %arg11[%113, %c0_80, %c0_81] : memref<8x8x128xf32, #tpu.memory_space<vmem>>, vector<1x8x128xf32>
    %115 = vector.shape_cast %114 : vector<1x8x128xf32> to vector<8x128xf32>
    %116 = vector.shape_cast %112 : vector<8x128xf32> to vector<1x8x128xf32>
    tpu.vector_store %arg11[%113, %c0_80, %c0_81], %116 {strides = array<i32>} : memref<8x8x128xf32, #tpu.memory_space<vmem>>, vector<1x8x128xf32>,
    %c2_i32_82 = arith.constant 2 : i32
    %117 = arith.index_cast %c2_i32_82 : i32 to index
    %c0_83 = arith.constant 0 : index
    %c0_84 = arith.constant 0 : index
    %118 = vector.load %arg11[%117, %c0_83, %c0_84] : memref<8x8x128xf32, #tpu.memory_space<vmem>>, vector<1x8x128xf32>
    %119 = vector.shape_cast %118 : vector<1x8x128xf32> to vector<8x128xf32>
    %cst_85 = arith.constant dense<0.000000e+00> : vector<8x128xf32>
    %120 = tpu.matmul %112, %100, %cst_85 {dimension_numbers = #tpu.dot_dimension_numbers<[1], [0], [0], [1], [0, 0, 1, 1], [], []>} : vector<8x128xf32>, vector<128x128xf32>, vector<8x128xf32> -> vector<8x128xf32>
    %121 = arith.addf %119, %120 : vector<8x128xf32>
    %122 = math.tanh %121 : vector<8x128xf32>
    %123 = arith.index_cast %c2_i32_82 : i32 to index
    %c0_86 = arith.constant 0 : index
    %c0_87 = arith.constant 0 : index
    %124 = vector.load %arg11[%123, %c0_86, %c0_87] : memref<8x8x128xf32, #tpu.memory_space<vmem>>, vector<1x8x128xf32>
    %125 = vector.shape_cast %124 : vector<1x8x128xf32> to vector<8x128xf32>
    %126 = vector.shape_cast %122 : vector<8x128xf32> to vector<1x8x128xf32>
    tpu.vector_store %arg11[%123, %c0_86, %c0_87], %126 {strides = array<i32>} : memref<8x8x128xf32, #tpu.memory_space<vmem>>, vector<1x8x128xf32>,
    %c3_i32_88 = arith.constant 3 : i32
    %127 = arith.index_cast %c3_i32_88 : i32 to index
    %c0_89 = arith.constant 0 : index
    %c0_90 = arith.constant 0 : index
    %128 = vector.load %arg11[%127, %c0_89, %c0_90] : memref<8x8x128xf32, #tpu.memory_space<vmem>>, vector<1x8x128xf32>
    %129 = vector.shape_cast %128 : vector<1x8x128xf32> to vector<8x128xf32>
    %cst_91 = arith.constant dense<0.000000e+00> : vector<8x128xf32>
    %130 = tpu.matmul %122, %100, %cst_91 {dimension_numbers = #tpu.dot_dimension_numbers<[1], [0], [0], [1], [0, 0, 1, 1], [], []>} : vector<8x128xf32>, vector<128x128xf32>, vector<8x128xf32> -> vector<8x128xf32>
    %131 = arith.addf %129, %130 : vector<8x128xf32>
    %132 = math.tanh %131 : vector<8x128xf32>
    %133 = arith.index_cast %c3_i32_88 : i32 to index
    %c0_92 = arith.constant 0 : index
    %c0_93 = arith.constant 0 : index
    %134 = vector.load %arg11[%133, %c0_92, %c0_93] : memref<8x8x128xf32, #tpu.memory_space<vmem>>, vector<1x8x128xf32>
    %135 = vector.shape_cast %134 : vector<1x8x128xf32> to vector<8x128xf32>
    %136 = vector.shape_cast %132 : vector<8x128xf32> to vector<1x8x128xf32>
    tpu.vector_store %arg11[%133, %c0_92, %c0_93], %136 {strides = array<i32>} : memref<8x8x128xf32, #tpu.memory_space<vmem>>, vector<1x8x128xf32>,
    %c4_i32_94 = arith.constant 4 : i32
    %137 = arith.index_cast %c4_i32_94 : i32 to index
    %c0_95 = arith.constant 0 : index
    %c0_96 = arith.constant 0 : index
    %138 = vector.load %arg11[%137, %c0_95, %c0_96] : memref<8x8x128xf32, #tpu.memory_space<vmem>>, vector<1x8x128xf32>
    %139 = vector.shape_cast %138 : vector<1x8x128xf32> to vector<8x128xf32>
    %cst_97 = arith.constant dense<0.000000e+00> : vector<8x128xf32>
    %140 = tpu.matmul %132, %100, %cst_97 {dimension_numbers = #tpu.dot_dimension_numbers<[1], [0], [0], [1], [0, 0, 1, 1], [], []>} : vector<8x128xf32>, vector<128x128xf32>, vector<8x128xf32> -> vector<8x128xf32>
    %141 = arith.addf %139, %140 : vector<8x128xf32>
    %142 = math.tanh %141 : vector<8x128xf32>
    %143 = arith.index_cast %c4_i32_94 : i32 to index
    %c0_98 = arith.constant 0 : index
    %c0_99 = arith.constant 0 : index
    %144 = vector.load %arg11[%143, %c0_98, %c0_99] : memref<8x8x128xf32, #tpu.memory_space<vmem>>, vector<1x8x128xf32>
    %145 = vector.shape_cast %144 : vector<1x8x128xf32> to vector<8x128xf32>
    %146 = vector.shape_cast %142 : vector<8x128xf32> to vector<1x8x128xf32>
    tpu.vector_store %arg11[%143, %c0_98, %c0_99], %146 {strides = array<i32>} : memref<8x8x128xf32, #tpu.memory_space<vmem>>, vector<1x8x128xf32>,
    %c5_i32_100 = arith.constant 5 : i32
    %147 = arith.index_cast %c5_i32_100 : i32 to index
    %c0_101 = arith.constant 0 : index
    %c0_102 = arith.constant 0 : index
    %148 = vector.load %arg11[%147, %c0_101, %c0_102] : memref<8x8x128xf32, #tpu.memory_space<vmem>>, vector<1x8x128xf32>
    %149 = vector.shape_cast %148 : vector<1x8x128xf32> to vector<8x128xf32>
    %cst_103 = arith.constant dense<0.000000e+00> : vector<8x128xf32>
    %150 = tpu.matmul %142, %100, %cst_103 {dimension_numbers = #tpu.dot_dimension_numbers<[1], [0], [0], [1], [0, 0, 1, 1], [], []>} : vector<8x128xf32>, vector<128x128xf32>, vector<8x128xf32> -> vector<8x128xf32>
    %151 = arith.addf %149, %150 : vector<8x128xf32>
    %152 = math.tanh %151 : vector<8x128xf32>
    %153 = arith.index_cast %c5_i32_100 : i32 to index
    %c0_104 = arith.constant 0 : index
    %c0_105 = arith.constant 0 : index
    %154 = vector.load %arg11[%153, %c0_104, %c0_105] : memref<8x8x128xf32, #tpu.memory_space<vmem>>, vector<1x8x128xf32>
    %155 = vector.shape_cast %154 : vector<1x8x128xf32> to vector<8x128xf32>
    %156 = vector.shape_cast %152 : vector<8x128xf32> to vector<1x8x128xf32>
    tpu.vector_store %arg11[%153, %c0_104, %c0_105], %156 {strides = array<i32>} : memref<8x8x128xf32, #tpu.memory_space<vmem>>, vector<1x8x128xf32>,
    %c6_i32_106 = arith.constant 6 : i32
    %157 = arith.index_cast %c6_i32_106 : i32 to index
    %c0_107 = arith.constant 0 : index
    %c0_108 = arith.constant 0 : index
    %158 = vector.load %arg11[%157, %c0_107, %c0_108] : memref<8x8x128xf32, #tpu.memory_space<vmem>>, vector<1x8x128xf32>
    %159 = vector.shape_cast %158 : vector<1x8x128xf32> to vector<8x128xf32>
    %cst_109 = arith.constant dense<0.000000e+00> : vector<8x128xf32>
    %160 = tpu.matmul %152, %100, %cst_109 {dimension_numbers = #tpu.dot_dimension_numbers<[1], [0], [0], [1], [0, 0, 1, 1], [], []>} : vector<8x128xf32>, vector<128x128xf32>, vector<8x128xf32> -> vector<8x128xf32>
    %161 = arith.addf %159, %160 : vector<8x128xf32>
    %162 = math.tanh %161 : vector<8x128xf32>
    %163 = arith.index_cast %c6_i32_106 : i32 to index
    %c0_110 = arith.constant 0 : index
    %c0_111 = arith.constant 0 : index
    %164 = vector.load %arg11[%163, %c0_110, %c0_111] : memref<8x8x128xf32, #tpu.memory_space<vmem>>, vector<1x8x128xf32>
    %165 = vector.shape_cast %164 : vector<1x8x128xf32> to vector<8x128xf32>
    %166 = vector.shape_cast %162 : vector<8x128xf32> to vector<1x8x128xf32>
    tpu.vector_store %arg11[%163, %c0_110, %c0_111], %166 {strides = array<i32>} : memref<8x8x128xf32, #tpu.memory_space<vmem>>, vector<1x8x128xf32>,
    %c7_i32_112 = arith.constant 7 : i32
    %167 = arith.index_cast %c7_i32_112 : i32 to index
    %c0_113 = arith.constant 0 : index
    %c0_114 = arith.constant 0 : index
    %168 = vector.load %arg11[%167, %c0_113, %c0_114] : memref<8x8x128xf32, #tpu.memory_space<vmem>>, vector<1x8x128xf32>
    %169 = vector.shape_cast %168 : vector<1x8x128xf32> to vector<8x128xf32>
    %cst_115 = arith.constant dense<0.000000e+00> : vector<8x128xf32>
    %170 = tpu.matmul %162, %100, %cst_115 {dimension_numbers = #tpu.dot_dimension_numbers<[1], [0], [0], [1], [0, 0, 1, 1], [], []>} : vector<8x128xf32>, vector<128x128xf32>, vector<8x128xf32> -> vector<8x128xf32>
    %171 = arith.addf %169, %170 : vector<8x128xf32>
    %172 = math.tanh %171 : vector<8x128xf32>
    %173 = arith.index_cast %c7_i32_112 : i32 to index
    %c0_116 = arith.constant 0 : index
    %c0_117 = arith.constant 0 : index
    %174 = vector.load %arg11[%173, %c0_116, %c0_117] : memref<8x8x128xf32, #tpu.memory_space<vmem>>, vector<1x8x128xf32>
    %175 = vector.shape_cast %174 : vector<1x8x128xf32> to vector<8x128xf32>
    %176 = vector.shape_cast %172 : vector<8x128xf32> to vector<1x8x128xf32>
    tpu.vector_store %arg11[%173, %c0_116, %c0_117], %176 {strides = array<i32>} : memref<8x8x128xf32, #tpu.memory_space<vmem>>, vector<1x8x128xf32>,
    %c7_i32_118 = arith.constant 7 : i32
    %c7 = arith.constant 7 : index
    %c0_119 = arith.constant 0 : index
    %c0_120 = arith.constant 0 : index
    %177 = vector.load %arg11[%c7, %c0_119, %c0_120] : memref<8x8x128xf32, #tpu.memory_space<vmem>>, vector<1x8x128xf32>
    %178 = vector.shape_cast %177 : vector<1x8x128xf32> to vector<8x128xf32>
    %c0_121 = arith.constant 0 : index
    %c0_122 = arith.constant 0 : index
    %179 = vector.load %arg6[%c0_121, %c0_122] : memref<128x128xf32, #tpu.memory_space<vmem>>, vector<128x128xf32>
    %cst_123 = arith.constant dense<0.000000e+00> : vector<8x128xf32>
    %180 = tpu.matmul %178, %179, %cst_123 {dimension_numbers = #tpu.dot_dimension_numbers<[1], [0], [0], [1], [0, 0, 1, 1], [], []>} : vector<8x128xf32>, vector<128x128xf32>, vector<8x128xf32> -> vector<8x128xf32>
    %c0_124 = arith.constant 0 : index
    %c0_125 = arith.constant 0 : index
    %181 = vector.load %arg7[%c0_124, %c0_125] : memref<1x128xf32, #tpu.memory_space<vmem>>, vector<1x128xf32>
    %182 = vector.broadcast %181 : vector<1x128xf32> to vector<8x128xf32>
    %183 = arith.addf %180, %182 : vector<8x128xf32>
    %cst_126 = arith.constant 0.000000e+00 : f32
    %184 = vector.broadcast %cst_126 : f32 to vector<8x128xf32>
    %185 = arith.maximumf %183, %184 : vector<8x128xf32>
    %c0_127 = arith.constant 0 : index
    %c0_128 = arith.constant 0 : index
    %186 = vector.load %arg8[%c0_127, %c0_128] : memref<128x128xf32, #tpu.memory_space<vmem>>, vector<128x128xf32>
    %cst_129 = arith.constant dense<0.000000e+00> : vector<8x128xf32>
    %187 = tpu.matmul %185, %186, %cst_129 {dimension_numbers = #tpu.dot_dimension_numbers<[1], [0], [0], [1], [0, 0, 1, 1], [], []>} : vector<8x128xf32>, vector<128x128xf32>, vector<8x128xf32> -> vector<8x128xf32>
    %c0_130 = arith.constant 0 : index
    %c0_131 = arith.constant 0 : index
    %188 = vector.load %arg9[%c0_130, %c0_131] : memref<1x128xf32, #tpu.memory_space<vmem>>, vector<1x128xf32>
    %189 = vector.broadcast %188 : vector<1x128xf32> to vector<8x128xf32>
    %190 = arith.addf %187, %189 : vector<8x128xf32>
    %191 = vector.shape_cast %190 : vector<8x128xf32> to vector<1x8x128xf32>
    %c0_132 = arith.constant 0 : index
    %c0_133 = arith.constant 0 : index
    %c0_134 = arith.constant 0 : index
    %192 = vector.load %arg10[%c0_132, %c0_133, %c0_134] : memref<1x8x128xf32, #tpu.memory_space<vmem>>, vector<1x8x128xf32>
    tpu.vector_store %arg10[%c0_132, %c0_133, %c0_134], %191 {strides = array<i32>} : memref<1x8x128xf32, #tpu.memory_space<vmem>>, vector<1x8x128xf32>,
    return
  }
  func.func @transform_0(%arg0: i32) -> (i32, i32, i32) {
    %c0_i32 = arith.constant 0 : i32
    %c0_i32_0 = arith.constant 0 : i32
    %c0_i32_1 = arith.constant 0 : i32
    return %c0_i32, %arg0, %c0_i32_0 : i32, i32, i32
  }
  func.func @transform_1(%arg0: i32) -> (i32, i32) {
    %c0_i32 = arith.constant 0 : i32
    %c0_i32_0 = arith.constant 0 : i32
    %c0_i32_1 = arith.constant 0 : i32
    return %c0_i32, %c0_i32_0 : i32, i32
  }
  func.func @transform_2(%arg0: i32) -> (i32, i32, i32) {
    %c0_i32 = arith.constant 0 : i32
    %c0_i32_0 = arith.constant 0 : i32
    %c0_i32_1 = arith.constant 0 : i32
    %c0_i32_2 = arith.constant 0 : i32
    return %c0_i32, %c0_i32_0, %c0_i32_1 : i32, i32, i32
  }
  func.func @transform_3(%arg0: i32) -> (i32, i32, i32) {
    %c0_i32 = arith.constant 0 : i32
    %c0_i32_0 = arith.constant 0 : i32
    %c0_i32_1 = arith.constant 0 : i32
    %c0_i32_2 = arith.constant 0 : i32
    return %c0_i32, %c0_i32_0, %c0_i32_1 : i32, i32, i32
  }
  func.func @transform_4(%arg0: i32) -> (i32, i32, i32) {
    %c0_i32 = arith.constant 0 : i32
    %c0_i32_0 = arith.constant 0 : i32
    %c0_i32_1 = arith.constant 0 : i32
    %c0_i32_2 = arith.constant 0 : i32
    return %c0_i32, %c0_i32_0, %c0_i32_1 : i32, i32, i32
  }
  func.func @transform_5(%arg0: i32) -> (i32, i32) {
    %c0_i32 = arith.constant 0 : i32
    %c0_i32_0 = arith.constant 0 : i32
    %c0_i32_1 = arith.constant 0 : i32
    return %c0_i32, %c0_i32_0 : i32, i32
  }
  func.func @transform_6(%arg0: i32) -> (i32, i32) {
    %c0_i32 = arith.constant 0 : i32
    %c0_i32_0 = arith.constant 0 : i32
    %c0_i32_1 = arith.constant 0 : i32
    return %c0_i32, %c0_i32_0 : i32, i32
  }
  func.func @transform_7(%arg0: i32) -> (i32, i32) {
    %c0_i32 = arith.constant 0 : i32
    %c0_i32_0 = arith.constant 0 : i32
    %c0_i32_1 = arith.constant 0 : i32
    return %c0_i32, %c0_i32_0 : i32, i32
  }
  func.func @transform_8(%arg0: i32) -> (i32, i32) {
    %c0_i32 = arith.constant 0 : i32
    %c0_i32_0 = arith.constant 0 : i32
    %c0_i32_1 = arith.constant 0 : i32
    return %c0_i32, %c0_i32_0 : i32, i32
  }
  func.func @transform_9(%arg0: i32) -> (i32, i32, i32) {
    %c0_i32 = arith.constant 0 : i32
    %c0_i32_0 = arith.constant 0 : i32
    %c0_i32_1 = arith.constant 0 : i32
    return %c0_i32, %arg0, %c0_i32_0 : i32, i32, i32
  }
}

</mosaic_0001>

<bundles_post_ra>
// kernel: rnn_model_forward.1
= control target key start
LH: loop header
LB: loop body
LE: loop exit
PB: predicated region body
PF: predicated region fallthrough
CT: control target
= control target key end

     0   :  { %14 = vsyncpa [#allocation4], 0  ;;  %s3692_s0 = inlined_call_operand.vmem [shape: f32[8,8,4], index: 0, kind: input, shape index: {}]   ;;  %s3693_s1 = inlined_call_operand.vmem [shape: f32[4,128], index: 1, kind: input, shape index: {}]   ;;  %s3694_s2 = inlined_call_operand.vmem [shape: f32[1,128,128], index: 2, kind: input, shape index: {}]   ;;  %s3695_s3 = inlined_call_operand.hbm [shape: f32[2,128,128], index: 3, kind: input, shape index: {}]   ;;  %s3696_s4 = inlined_call_operand.vmem [shape: f32[2,1,128], index: 4, kind: input, shape index: {}]   ;;  %s3697_s5 = inlined_call_operand.hbm [shape: f32[128,128], index: 5, kind: input, shape index: {}]   ;;  %s3698_s6 = inlined_call_operand.vmem [shape: f32[1,128], index: 6, kind: input, shape index: {}]   ;;  %s3699_s7 = inlined_call_operand.hbm [shape: f32[128,128], index: 7, kind: input, shape index: {}]   ;;  %s3700_s8 = inlined_call_operand.vmem [shape: f32[1,128], index: 8, kind: input, shape index: {}]   ;;  %s3701_s9 = inlined_call_operand.vmem [shape: f32[1,8,128], index: 9, kind: output, shape index: {}]  }
   0x1   :  { %15 = vsyncpa [#allocation6], 0  ;;  %s3116_s30 = smov [#allocation5]   ;;  %s3117_s11 = smov [#allocation3]  }
   0x2   :  { %s41_s10 = sshll.u32 %s3116_s30, 4  ;;  %s27_s12 = sshll.u32 %s3117_s11, 4  ;;  %s42_s10 = int_to_ptr.vmem [resolvable:$true] %s41_s10  ;;  %s3174_s12 = int_to_ptr.vmem [resolvable:$true] %s27_s12 }
   0x3   :  { %s3046_s15 = scalar_lea.hbm %s3697_s5, 2048 }
   0x4   :  { %p3047_p0 = scmp.ne.s32.totalorder %s3697_s5, %s3046_s15  ;;  %p3050_p1 = scmp.lt.u32.totalorder %s3046_s15, %s3697_s5 }
   0x6   :  { %p3052_p2 = pnand %p3050_p1, %p3047_p0 }
   0x8   :  { %3055 = shalt.err (!%p3052_p2)
}
   0x9   :  { %s3056_s20 = scalar_lea.vmem %s42_s10, 2048  ;;  %p3061_p4 = scmp.lt.s32.totalorder %s42_s10, %s42_s10 }
   0xa   :  { %p3057_p3 = scmp.ne.s32.totalorder %s42_s10, %s3056_s20  ;;  %p3062_p5 = scmp.lt.s32.totalorder %s3056_s20, %s3056_s20 }
   0xc   :  { %p3063_p6 = por %p3062_p5, %p3061_p4 }
   0xe   :  { %p3064_p7 = pnand %p3063_p6, %p3057_p3 }
  0x10   :  { %3067 = shalt.err (!%p3064_p7)
}
  0x11   :  { %s3118_s21 = smov 128   ;;  %s3119_s22 = smov 8  }
  0x12   :  { %47 = dma.hbm_to_vmem [thread:$0]  %s3697_s5, 2048, %s42_s10, [#allocation6], %s3118_s21, %s3118_s21, %s3119_s22  }
  0x13   :  { %s3068_s27 = scalar_lea.hbm %s3695_s3, 4096 }
  0x14   :  { %p3069_p8 = scmp.ne.s32.totalorder %s3695_s3, %s3068_s27  ;;  %p3072_p9 = scmp.lt.u32.totalorder %s3068_s27, %s3695_s3 }
  0x16   :  { %p3074_p10 = pnand %p3072_p9, %p3069_p8 }
  0x18   :  { %3077 = shalt.err (!%p3074_p10)
}
  0x19   :  { %s3078_s13 = scalar_lea.vmem %s3174_s12, 4096  ;;  %p3083_p12 = scmp.lt.s32.totalorder %s3174_s12, %s3174_s12 }
  0x1a   :  { %p3079_p11 = scmp.ne.s32.totalorder %s3174_s12, %s3078_s13  ;;  %p3084_p13 = scmp.lt.s32.totalorder %s3078_s13, %s3078_s13 }
  0x1c   :  { %p3085_p0 = por %p3084_p13, %p3083_p12 }
  0x1e   :  { %p3086_p1 = pnand %p3085_p0, %p3079_p11 }
  0x20   :  { %3089 = shalt.err (!%p3086_p1)
}
  0x21   :  { %33 = dma.hbm_to_vmem [thread:$0]  %s3695_s3, 4096, %s3174_s12, [#allocation4], %s3118_s21, %s3118_s21, %s3119_s22  }
  0x22   :  { %s3120_s14 = smov [#allocation7]   ;;  %s3090_s18 = scalar_lea.hbm %s3699_s7, 2048 }
  0x23   :  { %s55_s15 = sshll.u32 %s3120_s14, 4  ;;  %p3091_p2 = scmp.ne.s32.totalorder %s3699_s7, %s3090_s18  ;;  %s56_s15 = int_to_ptr.vmem [resolvable:$true] %s55_s15 }
  0x24   :  { %p3094_p3 = scmp.lt.u32.totalorder %s3090_s18, %s3699_s7 }
  0x26   :  { %p3096_p4 = pnand %p3094_p3, %p3091_p2 }
  0x28   :  { %3099 = shalt.err (!%p3096_p4)
}
  0x29   :  { %s3100_s25 = scalar_lea.vmem %s56_s15, 2048  ;;  %p3105_p6 = scmp.lt.s32.totalorder %s56_s15, %s56_s15 }
  0x2a   :  { %p3101_p5 = scmp.ne.s32.totalorder %s56_s15, %s3100_s25  ;;  %p3106_p7 = scmp.lt.s32.totalorder %s3100_s25, %s3100_s25 }
  0x2c   :  { %p3107_p8 = por %p3106_p7, %p3105_p6 }
  0x2e   :  { %p3108_p9 = pnand %p3107_p8, %p3101_p5 }
  0x30   :  { %3111 = shalt.err (!%p3108_p9)
}
  0x31   :  { %61 = dma.hbm_to_vmem [thread:$0]  %s3699_s7, 2048, %s56_s15, [#allocation6], %s3118_s21, %s3118_s21, %s3119_s22  }
  0x32   :  { %3112 = dma.done.wait [#allocation4], 4096  }
  0x33   :  { %3113 = vsyncadd [#allocation4], 4294963200 }
  0x34   :  { %3114 = dma.done.wait [#allocation6], 4096  }
  0x35   :  { %3115 = vsyncadd [#allocation6], 4294963200  ;;  %v3121_v0 = vmov 0.0|0.0   ;;  %vm114_vm0 = vcmask 1043456   ;;  %vm89_vm1 = vcmask 31744   ;;  %v74_v2 = vld [vmem:[%s3692_s0] sm:$0xff] }
  0x36   :  { %2590 = vmatprep.subr.bf16.mxu1 %v3121_v0  ;;  %v82_v1 = vld [vmem:[%s3693_s1] sm:$0xf]  ;;  %v75_v3 = vld [vmem:[%s3692_s0 + $0x8] sm:$0xff]  ;;  %1974 = vmatprep.mubr.msk.f32.mxu0 %vm89_vm1, %v74_v2  ;;  %v233_v6 = vld [vmem:[#allocation3 + $0x10] sm:$0xff]  ;;  %vm3122_vm2 = vmmov 0   ;;  %v3123_v27 = vmov 0.0  }
  0x37   :  { %1972 = vmatprep.subr.msk.mxu0 %vm114_vm0, %v82_v1  ;;  %v231_v4 = vld [vmem:[#allocation3] sm:$0xff]  ;;  %v232_v5 = vld [vmem:[#allocation3 + $0x8] sm:$0xff]  ;;  %v234_v8 = vld [vmem:[#allocation3 + $0x18] sm:$0xff]  ;;  %2018 = vmatprep.mubr.msk.f32.mxu1 %vm3122_vm2, %v3123_v27 }
  0x38   :  { %1973 = vmatpush3.msk.msra.mxu0 %vm114_vm0, %v82_v1  ;;  %v3237_v7 = vpack.c.bf16 %v232_v5, %v231_v4  ;;  %v3242_v9 = vpack.c.bf16 %v234_v8, %v233_v6  ;;  %v235_v10 = vld [vmem:[#allocation3 + $0x20] sm:$0xff]  ;;  %v236_v11 = vld [vmem:[#allocation3 + $0x28] sm:$0xff]  ;;  %v237_v13 = vld [vmem:[#allocation3 + $0x30] sm:$0xff] }
  0x39   :  { %1975 = vmatmul.mubr.msk.f32.vlgmr.msra.gmra.mrb[0].mxu0 %vm89_vm1, %v75_v3  ;;  %2614 = vmatprep.subr.bf16.mxu0 %v3121_v0  ;;  %v3248_v12 = vpack.c.bf16 %v236_v11, %v235_v10  ;;  %v238_v14 = vld [vmem:[#allocation3 + $0x38] sm:$0xff]  ;;  %v239_v16 = vld [vmem:[#allocation3 + $0x40] sm:$0xff]  ;;  %v240_v17 = vld [vmem:[#allocation3 + $0x48] sm:$0xff] }
  0x3a   :  { %2592 = vmatpush3.bf16.msra.mxu1 %v3237_v7  ;;  %2616 = vmatpush3.bf16.msra.mxu0 %v3237_v7  ;;  %v3254_v15 = vpack.c.bf16 %v238_v14, %v237_v13  ;;  %v3263_v18 = vpack.c.bf16 %v240_v17, %v239_v16  ;;  %v241_v19 = vld [vmem:[#allocation3 + $0x50] sm:$0xff]  ;;  %v242_v20 = vld [vmem:[#allocation3 + $0x58] sm:$0xff]  ;;  %v243_v22 = vld [vmem:[#allocation3 + $0x60] sm:$0xff] }
  0x3b   :  { %2593 = vmatprep.subr.bf16.mxu1 %v3121_v0  ;;  %2617 = vmatprep.subr.bf16.mxu0 %v3121_v0  ;;  %v3269_v21 = vpack.c.bf16 %v242_v20, %v241_v19  ;;  %v244_v23 = vld [vmem:[#allocation3 + $0x68] sm:$0xff]  ;;  %v245_v25 = vld [vmem:[#allocation3 + $0x70] sm:$0xff]  ;;  %v246_v26 = vld [vmem:[#allocation3 + $0x78] sm:$0xff] }
  0x3c   :  { %v3274_v24 = vpack.c.bf16 %v244_v23, %v243_v22  ;;  %v3280_v28 = vpack.c.bf16 %v246_v26, %v245_v25  ;;  %v76_v29 = vld [vmem:[%s3692_s0 + $0x10] sm:$0xff]  ;;  %v3296_v30 = vld [vmem:[%s3696_s4] ss:$0 sm:$0xff]  ;;  %v77_v35 = vld [vmem:[%s3692_s0 + $0x18] sm:$0xff] }
  0x3d   :  { %1977 = vmatprep.mubr.msk.f32.mxu0 %vm89_vm1, %v76_v29  ;;  %v78_v36 = vld [vmem:[%s3692_s0 + $0x20] sm:$0xff]  ;;  %v79_v37 = vld [vmem:[%s3692_s0 + $0x28] sm:$0xff]  ;;  %v80_v38 = vld [vmem:[%s3692_s0 + $0x30] sm:$0xff] }
  0x3e   :  { %2595 = vmatpush3.bf16.msra.mxu1 %v3242_v9  ;;  %2619 = vmatpush3.bf16.msra.mxu0 %v3242_v9  ;;  %v81_v39 = vld [vmem:[%s3692_s0 + $0x38] sm:$0xff]  ;;  %v785_v3 = vld [vmem:[%s3694_s2] sm:$0xff]  ;;  %v786_v4 = vld [vmem:[%s3694_s2 + $0x8] sm:$0xff] }
  0x3f   :  { %2596 = vmatprep.subr.bf16.mxu1 %v3121_v0  ;;  %2620 = vmatprep.subr.bf16.mxu0 %v3121_v0  ;;  %v2758_v5 = vpack.c.bf16 %v786_v4, %v785_v3  ;;  %v787_v10 = vld [vmem:[%s3694_s2 + $0x10] sm:$0xff]  ;;  %v788_v11 = vld [vmem:[%s3694_s2 + $0x18] sm:$0xff]  ;;  %v789_v14 = vld [vmem:[%s3694_s2 + $0x20] sm:$0xff] }
  0x40   :  { %1978 = vmatmul.mubr.msk.f32.gmra.mrb[2].mxu0 %vm89_vm1, %v77_v35  ;;  %v791_v17 = vld [vmem:[%s3694_s2 + $0x30] sm:$0xff]  ;;  %v793_v20 = vld [vmem:[%s3694_s2 + $0x40] sm:$0xff]  ;;  %v922_v35 = vld [vmem:[#allocation3 + $0x88] sm:$0xff] }
  0x41   :  { %1980 = vmatprep.mubr.msk.f32.mxu0 %vm89_vm1, %v78_v36  ;;  %v795_v23 = vld [vmem:[%s3694_s2 + $0x50] sm:$0xff]  ;;  %v797_v26 = vld [vmem:[%s3694_s2 + $0x60] sm:$0xff] }
  0x42   :  { %2598 = vmatpush3.bf16.msra.mxu1 %v3248_v12  ;;  %2622 = vmatpush3.bf16.msra.mxu0 %v3248_v12 }
  0x43   :  { %2599 = vmatprep.subr.bf16.mxu1 %v3121_v0  ;;  %2623 = vmatprep.subr.bf16.mxu0 %v3121_v0 }
  0x44   :  { %1981 = vmatmul.mubr.msk.f32.gmra.mrb[4].mxu0 %vm89_vm1, %v79_v37  ;;  %v923_v37 = vld [vmem:[#allocation3 + $0x90] sm:$0xff] }
  0x45   :  { %1983 = vmatprep.mubr.msk.f32.mxu0 %vm89_vm1, %v80_v38  ;;  %v924_v38 = vld [vmem:[#allocation3 + $0x98] sm:$0xff] }
  0x46   :  { %2601 = vmatpush3.bf16.msra.mxu1 %v3254_v15  ;;  %2625 = vmatpush3.bf16.msra.mxu0 %v3254_v15 }
  0x47   :  { %2602 = vmatprep.subr.bf16.mxu1 %v3121_v0  ;;  %2626 = vmatprep.subr.bf16.mxu0 %v3121_v0 }
  0x48   :  { %1984 = vmatmul.mubr.msk.f32.gmra.mrb[6].mxu0 %vm89_vm1, %v81_v39  ;;  %v3495_v39 = vpack.c.bf16 %v924_v38, %v923_v37 }
  0x49   :  { %2053 = vmatprep.mubr.msk.f32.mxu0 %vm3122_vm2, %v3123_v27 }
  0x4a   :  { %2604 = vmatpush3.bf16.msra.mxu1 %v3263_v18  ;;  %2628 = vmatpush3.bf16.msra.mxu0 %v3263_v18 }
  0x4b   :  { %2605 = vmatprep.subr.bf16.mxu1 %v3121_v0  ;;  %2629 = vmatprep.subr.bf16.mxu0 %v3121_v0 }
  0x4e   :  { %2607 = vmatpush3.bf16.msra.mxu1 %v3269_v21  ;;  %2631 = vmatpush3.bf16.msra.mxu0 %v3269_v21 }
  0x4f   :  { %2608 = vmatprep.subr.bf16.mxu1 %v3121_v0  ;;  %2632 = vmatprep.subr.bf16.mxu0 %v3121_v0 }
  0x52   :  { %2610 = vmatpush3.bf16.msra.mxu1 %v3274_v24  ;;  %2634 = vmatpush3.bf16.msra.mxu0 %v3274_v24 }
  0x53   :  { %2611 = vmatprep.subr.bf16.mxu1 %v3121_v0  ;;  %2635 = vmatprep.subr.bf16.mxu0 %v3121_v0 }
  0x56   :  { %2613 = vmatpush3.bf16.msra.mxu1 %v3280_v28  ;;  %2637 = vmatpush3.bf16.msra.mxu0 %v3280_v28 }
  0x57   :  { %2638 = vmatprep.subr.bf16.mxu1 %v3121_v0  ;;  %2662 = vmatprep.subr.bf16.mxu0 %v3121_v0 }
 0x10c   :  { %v1976_v31 = vpop.f32.mrb[0].mxu0 }
 0x10d   :  { %v184_v32 = vpop.f32.mrb[1].mxu0  ;;  %v190_v40 = vadd.f32 %v1976_v31, %v3296_v30  ;;  %v799_v31 = vld [vmem:[%s3694_s2 + $0x70] sm:$0xff] }
 0x10e   :  { %v185_v33 = vadd.f32 %v3296_v30, %v184_v32  ;;  %v800_v32 = vld [vmem:[%s3694_s2 + $0x78] sm:$0xff] }
 0x110   :  { %3014 = vtanh.f32 %v185_v33  ;;  %v2786_v33 = vpack.c.bf16 %v800_v32, %v799_v31 }
 0x113   :  { %v1979_v45 = vpop.f32.mrb[2].mxu0 }
 0x114   :  { %v194_v46 = vpop.f32.mrb[3].mxu0  ;;  %v200_v56 = vadd.f32 %v1979_v45, %v3296_v30 }
 0x115   :  { %v195_v51 = vadd.f32 %v3296_v30, %v194_v46  ;;  %v929_v46 = vld [vmem:[#allocation3 + $0xc0] sm:$0xff] }
 0x117   :  { %v3364_v47 = vpop.f32.mrb[4].mxu0 }
 0x118   :  { %v204_v48 = vpop.f32.mrb[5].mxu0  ;;  %v210_v6 = vadd.f32 %v3364_v47, %v3296_v30  ;;  %v930_v47 = vld [vmem:[#allocation3 + $0xc8] sm:$0xff] }
 0x119   :  { %v205_v61 = vadd.f32 %v3296_v30, %v204_v48  ;;  %v3507_v48 = vpack.c.bf16 %v930_v47, %v929_v46  ;;  %v1462_v46 = vld [vmem:[#allocation5 + $0x18] sm:$0xff] }
 0x11a   :  { %v3299_v34 = vpop.eup %3014 }
 0x11b   :  { %2019 = vmatmul.mubr.f32.vlgmr.msra.gmra.mrb[0].mxu1 %v3299_v34  ;;  %v3366_v49 = vpop.f32.mrb[6].mxu0 }
 0x11c   :  { %2640 = vmatpush3.bf16.msra.mxu1 %v3237_v7  ;;  %2088 = vmatprep.mubr.msk.f32.mxu1 %vm3122_vm2, %v3123_v27  ;;  %v3368_v50 = vpop.f32.mrb[7].mxu0 }
 0x11d   :  { %2641 = vmatprep.subr.bf16.mxu1 %v3121_v0 }
 0x120   :  { %2643 = vmatpush3.bf16.msra.mxu1 %v3242_v9 }
 0x121   :  { %2644 = vmatprep.subr.bf16.mxu1 %v3121_v0 }
 0x124   :  { %2646 = vmatpush3.bf16.msra.mxu1 %v3248_v12 }
 0x125   :  { %2647 = vmatprep.subr.bf16.mxu1 %v3121_v0 }
 0x128   :  { %2649 = vmatpush3.bf16.msra.mxu1 %v3254_v15 }
 0x129   :  { %2650 = vmatprep.subr.bf16.mxu1 %v3121_v0 }
 0x12c   :  { %2652 = vmatpush3.bf16.msra.mxu1 %v3263_v18 }
 0x12d   :  { %2653 = vmatprep.subr.bf16.mxu1 %v3121_v0 }
 0x130   :  { %2655 = vmatpush3.bf16.msra.mxu1 %v3269_v21 }
 0x131   :  { %2656 = vmatprep.subr.bf16.mxu1 %v3121_v0 }
 0x134   :  { %2658 = vmatpush3.bf16.msra.mxu1 %v3274_v24 }
 0x135   :  { %2659 = vmatprep.subr.bf16.mxu1 %v3121_v0 }
 0x138   :  { %2661 = vmatpush3.bf16.msra.mxu1 %v3280_v28 }
 0x139   :  { %2686 = vmatprep.subr.bf16.mxu1 %v3121_v0 }
 0x1ee   :  { %v318_v41 = vpop.f32.mrb[0].mxu1 }
 0x1ef   :  { %v322_v42 = vadd.f32 %v318_v41, %v190_v40  ;;  %v2020_v43 = vpop.f32.mrb[1].mxu1  ;;  %v925_v40 = vld [vmem:[#allocation3 + $0xa0] sm:$0xff]  ;;  %v926_v41 = vld [vmem:[#allocation3 + $0xa8] sm:$0xff] }
 0x1f0   :  { %v927_v43 = vld [vmem:[#allocation3 + $0xb0] sm:$0xff] }
 0x1f1   :  { %3016 = vtanh.f32 %v322_v42  ;;  %v3499_v42 = vpack.c.bf16 %v926_v41, %v925_v40 }
 0x1fb   :  { %v3343_v44 = vpop.eup %3016 }
 0x1fc   :  { %2054 = vmatmul.mubr.f32.vlgmr.msra.gmra.mrb[8].mxu0 %v3343_v44 }
 0x1fd   :  { %2664 = vmatpush3.bf16.msra.mxu0 %v3237_v7  ;;  %2123 = vmatprep.mubr.msk.f32.mxu0 %vm3122_vm2, %v3123_v27 }
 0x1fe   :  { %2665 = vmatprep.subr.bf16.mxu0 %v3121_v0 }
 0x201   :  { %2667 = vmatpush3.bf16.msra.mxu0 %v3242_v9 }
 0x202   :  { %2668 = vmatprep.subr.bf16.mxu0 %v3121_v0 }
 0x205   :  { %2670 = vmatpush3.bf16.msra.mxu0 %v3248_v12 }
 0x206   :  { %2671 = vmatprep.subr.bf16.mxu0 %v3121_v0 }
 0x209   :  { %2673 = vmatpush3.bf16.msra.mxu0 %v3254_v15 }
 0x20a   :  { %2674 = vmatprep.subr.bf16.mxu0 %v3121_v0 }
 0x20d   :  { %2676 = vmatpush3.bf16.msra.mxu0 %v3263_v18 }
 0x20e   :  { %2677 = vmatprep.subr.bf16.mxu0 %v3121_v0 }
 0x211   :  { %2679 = vmatpush3.bf16.msra.mxu0 %v3269_v21 }
 0x212   :  { %2680 = vmatprep.subr.bf16.mxu0 %v3121_v0 }
 0x215   :  { %2682 = vmatpush3.bf16.msra.mxu0 %v3274_v24 }
 0x216   :  { %2683 = vmatprep.subr.bf16.mxu0 %v3121_v0 }
 0x219   :  { %2685 = vmatpush3.bf16.msra.mxu0 %v3280_v28 }
 0x21a   :  { %2710 = vmatprep.subr.bf16.mxu0 %v3121_v0 }
 0x2cf   :  { %v393_v52 = vpop.f32.mrb[8].mxu0 }
 0x2d0   :  { %v397_v53 = vadd.f32 %v393_v52, %v195_v51  ;;  %v2055_v54 = vpop.f32.mrb[9].mxu0  ;;  %v931_v51 = vld [vmem:[#allocation3 + $0xd0] sm:$0xff]  ;;  %v932_v52 = vld [vmem:[#allocation3 + $0xd8] sm:$0xff] }
 0x2d1   :  { %v933_v54 = vld [vmem:[#allocation3 + $0xe0] sm:$0xff] }
 0x2d2   :  { %3018 = vtanh.f32 %v397_v53  ;;  %v3511_v53 = vpack.c.bf16 %v932_v52, %v931_v51  ;;  %v1464_v51 = vld [vmem:[#allocation5 + $0x28] sm:$0xff] }
 0x2dc   :  { %v3371_v55 = vpop.eup %3018 }
 0x2dd   :  { %2089 = vmatmul.mubr.f32.vlgmr.msra.gmra.mrb[2].mxu1 %v3371_v55 }
 0x2de   :  { %2688 = vmatpush3.bf16.msra.mxu1 %v3237_v7  ;;  %2158 = vmatprep.mubr.msk.f32.mxu1 %vm3122_vm2, %v3123_v27 }
 0x2df   :  { %2689 = vmatprep.subr.bf16.mxu1 %v3121_v0 }
 0x2e2   :  { %2691 = vmatpush3.bf16.msra.mxu1 %v3242_v9 }
 0x2e3   :  { %2692 = vmatprep.subr.bf16.mxu1 %v3121_v0 }
 0x2e6   :  { %2694 = vmatpush3.bf16.msra.mxu1 %v3248_v12 }
 0x2e7   :  { %2695 = vmatprep.subr.bf16.mxu1 %v3121_v0 }
 0x2ea   :  { %2697 = vmatpush3.bf16.msra.mxu1 %v3254_v15 }
 0x2eb   :  { %2698 = vmatprep.subr.bf16.mxu1 %v3121_v0 }
 0x2ee   :  { %2700 = vmatpush3.bf16.msra.mxu1 %v3263_v18 }
 0x2ef   :  { %2701 = vmatprep.subr.bf16.mxu1 %v3121_v0 }
 0x2f2   :  { %2703 = vmatpush3.bf16.msra.mxu1 %v3269_v21 }
 0x2f3   :  { %2704 = vmatprep.subr.bf16.mxu1 %v3121_v0 }
 0x2f6   :  { %2706 = vmatpush3.bf16.msra.mxu1 %v3274_v24 }
 0x2f7   :  { %2707 = vmatprep.subr.bf16.mxu1 %v3121_v0 }
 0x2fa   :  { %2709 = vmatpush3.bf16.msra.mxu1 %v3280_v28 }
 0x2fb   :  { %2734 = vmatprep.subr.bf16.mxu1 %v3121_v0 }
 0x3b0   :  { %v468_v57 = vpop.f32.mrb[2].mxu1 }
 0x3b1   :  { %v472_v58 = vadd.f32 %v468_v57, %v200_v56  ;;  %v2090_v59 = vpop.f32.mrb[3].mxu1  ;;  %v935_v57 = vld [vmem:[#allocation3 + $0xf0] sm:$0xff] }
 0x3b3   :  { %3020 = vtanh.f32 %v472_v58  ;;  %v936_v58 = vld [vmem:[#allocation3 + $0xf8] sm:$0xff] }
 0x3b4   :  { %v3519_v59 = vpack.c.bf16 %v936_v58, %v935_v57  ;;  %v1468_v57 = vld [vmem:[#allocation5 + $0x48] sm:$0xff] }
 0x3bd   :  { %v3393_v60 = vpop.eup %3020 }
 0x3be   :  { %2124 = vmatmul.mubr.f32.vlgmr.msra.gmra.mrb[10].mxu0 %v3393_v60 }
 0x3bf   :  { %2712 = vmatpush3.bf16.msra.mxu0 %v3237_v7  ;;  %2193 = vmatprep.mubr.msk.f32.mxu0 %vm3122_vm2, %v3123_v27 }
 0x3c0   :  { %2713 = vmatprep.subr.bf16.mxu0 %v3121_v0 }
 0x3c3   :  { %2715 = vmatpush3.bf16.msra.mxu0 %v3242_v9 }
 0x3c4   :  { %2716 = vmatprep.subr.bf16.mxu0 %v3121_v0 }
 0x3c7   :  { %2718 = vmatpush3.bf16.msra.mxu0 %v3248_v12 }
 0x3c8   :  { %2719 = vmatprep.subr.bf16.mxu0 %v3121_v0 }
 0x3cb   :  { %2721 = vmatpush3.bf16.msra.mxu0 %v3254_v15 }
 0x3cc   :  { %2722 = vmatprep.subr.bf16.mxu0 %v3121_v0 }
 0x3cf   :  { %2724 = vmatpush3.bf16.msra.mxu0 %v3263_v18 }
 0x3d0   :  { %2725 = vmatprep.subr.bf16.mxu0 %v3121_v0 }
 0x3d3   :  { %2727 = vmatpush3.bf16.msra.mxu0 %v3269_v21 }
 0x3d4   :  { %2728 = vmatprep.subr.bf16.mxu0 %v3121_v0 }
 0x3d7   :  { %2730 = vmatpush3.bf16.msra.mxu0 %v3274_v24 }
 0x3d8   :  { %2731 = vmatprep.subr.bf16.mxu0 %v3121_v0 }
 0x3db   :  { %2733 = vmatpush3.bf16.msra.mxu0 %v3280_v28 }
 0x3dc   :  { %2759 = vmatprep.subr.bf16.mxu0 %v2758_v5 }
 0x491   :  { %v543_v62 = vpop.f32.mrb[10].mxu0 }
 0x492   :  { %v547_v63 = vadd.f32 %v543_v62, %v205_v61  ;;  %v2125_v1 = vpop.f32.mrb[11].mxu0 }
 0x494   :  { %3022 = vtanh.f32 %v547_v63 }
 0x49e   :  { %v3414_v2 = vpop.eup %3022 }
 0x49f   :  { %2159 = vmatmul.mubr.f32.vlgmr.msra.gmra.mrb[4].mxu1 %v3414_v2 }
 0x4a0   :  { %2736 = vmatpush3.bf16.msra.mxu1 %v3237_v7  ;;  %2228 = vmatprep.mubr.msk.f32.mxu1 %vm3122_vm2, %v3123_v27 }
 0x4a1   :  { %2737 = vmatprep.subr.bf16.mxu1 %v3121_v0 }
 0x4a4   :  { %2739 = vmatpush3.bf16.msra.mxu1 %v3242_v9 }
 0x4a5   :  { %2740 = vmatprep.subr.bf16.mxu1 %v3121_v0 }
 0x4a8   :  { %2742 = vmatpush3.bf16.msra.mxu1 %v3248_v12  ;;  %v2762_v12 = vpack.c.bf16 %v788_v11, %v787_v10  ;;  %v220_v10 = vadd.f32 %v3366_v49, %v3296_v30 }
 0x4a9   :  { %2743 = vmatprep.subr.bf16.mxu1 %v3121_v0 }
 0x4ac   :  { %2745 = vmatpush3.bf16.msra.mxu1 %v3254_v15  ;;  %v790_v15 = vld [vmem:[%s3694_s2 + $0x28] sm:$0xff] }
 0x4ad   :  { %2746 = vmatprep.subr.bf16.mxu1 %v3121_v0  ;;  %v2766_v16 = vpack.c.bf16 %v790_v15, %v789_v14 }
 0x4b0   :  { %2748 = vmatpush3.bf16.msra.mxu1 %v3263_v18  ;;  %v792_v18 = vld [vmem:[%s3694_s2 + $0x38] sm:$0xff] }
 0x4b1   :  { %2749 = vmatprep.subr.bf16.mxu1 %v3121_v0  ;;  %v2770_v19 = vpack.c.bf16 %v792_v18, %v791_v17 }
 0x4b4   :  { %2751 = vmatpush3.bf16.msra.mxu1 %v3269_v21  ;;  %v794_v21 = vld [vmem:[%s3694_s2 + $0x48] sm:$0xff] }
 0x4b5   :  { %2752 = vmatprep.subr.bf16.mxu1 %v3121_v0  ;;  %v2774_v22 = vpack.c.bf16 %v794_v21, %v793_v20 }
 0x4b8   :  { %2754 = vmatpush3.bf16.msra.mxu1 %v3274_v24  ;;  %v796_v24 = vld [vmem:[%s3694_s2 + $0x58] sm:$0xff] }
 0x4b9   :  { %2755 = vmatprep.subr.bf16.mxu1 %v3121_v0  ;;  %v2778_v25 = vpack.c.bf16 %v796_v24, %v795_v23 }
 0x4bc   :  { %2757 = vmatpush3.bf16.msra.mxu1 %v3280_v28  ;;  %v798_v28 = vld [vmem:[%s3694_s2 + $0x68] sm:$0xff] }
 0x4bd   :  { %2790 = vmatprep.subr.bf16.mxu1 %v3121_v0  ;;  %v2782_v29 = vpack.c.bf16 %v798_v28, %v797_v26 }
 0x572   :  { %v618_v7 = vpop.f32.mrb[4].mxu1 }
 0x573   :  { %v622_v8 = vadd.f32 %v618_v7, %v210_v6  ;;  %v2160_v9 = vpop.f32.mrb[5].mxu1 }
 0x575   :  { %3024 = vtanh.f32 %v622_v8 }
 0x57f   :  { %v3025_v13 = vpop.eup %3024 }
 0x580   :  { %2194 = vmatmul.mubr.f32.vlgmr.msra.gmra.mrb[12].mxu0 %v3025_v13 }
 0x581   :  { %2761 = vmatpush3.bf16.msra.mxu0 %v2758_v5  ;;  %2263 = vmatprep.mubr.f32.mxu0 %v3299_v34  ;;  %v921_v34 = vld [vmem:[#allocation3 + $0x80] sm:$0xff] }
 0x582   :  { %2763 = vmatprep.subr.bf16.mxu0 %v2762_v12  ;;  %v3491_v36 = vpack.c.bf16 %v922_v35, %v921_v34 }
 0x585   :  { %2765 = vmatpush3.bf16.msra.mxu0 %v2762_v12 }
 0x586   :  { %2767 = vmatprep.subr.bf16.mxu0 %v2766_v16 }
 0x589   :  { %2769 = vmatpush3.bf16.msra.mxu0 %v2766_v16 }
 0x58a   :  { %2771 = vmatprep.subr.bf16.mxu0 %v2770_v19 }
 0x58d   :  { %2773 = vmatpush3.bf16.msra.mxu0 %v2770_v19 }
 0x58e   :  { %2775 = vmatprep.subr.bf16.mxu0 %v2774_v22 }
 0x591   :  { %2777 = vmatpush3.bf16.msra.mxu0 %v2774_v22 }
 0x592   :  { %2779 = vmatprep.subr.bf16.mxu0 %v2778_v25 }
 0x595   :  { %2781 = vmatpush3.bf16.msra.mxu0 %v2778_v25 }
 0x596   :  { %2783 = vmatprep.subr.bf16.mxu0 %v2782_v29 }
 0x599   :  { %2785 = vmatpush3.bf16.msra.mxu0 %v2782_v29 }
 0x59a   :  { %2787 = vmatprep.subr.bf16.mxu0 %v2786_v33 }
 0x59d   :  { %2789 = vmatpush3.bf16.msra.mxu0 %v2786_v33 }
 0x59e   :  { %2814 = vmatprep.subr.bf16.mxu0 %v3121_v0 }
 0x5a0   :  { %2264 = vmatmul.mubr.f32.vlgmr.msra.gmra.mrb[14].mxu0 %v3343_v44  ;;  %v928_v44 = vld [vmem:[#allocation3 + $0xb8] sm:$0xff] }
 0x5a1   :  { %2266 = vmatprep.mubr.f32.mxu0 %v3371_v55  ;;  %2816 = vmatpush3.bf16.msra.mxu0 %v3491_v36  ;;  %v3503_v45 = vpack.c.bf16 %v928_v44, %v927_v43  ;;  %v934_v55 = vld [vmem:[#allocation3 + $0xe8] sm:$0xff]  ;;  %v1461_v44 = vld [vmem:[#allocation5 + $0x10] sm:$0xff] }
 0x5a2   :  { %2817 = vmatprep.subr.bf16.mxu0 %v3121_v0  ;;  %v3515_v56 = vpack.c.bf16 %v934_v55, %v933_v54  ;;  %v1460_v43 = vld [vmem:[#allocation5 + $0x8] sm:$0xff]  ;;  %v2962_v47 = vpack.c.bf16 %v1462_v46, %v1461_v44  ;;  %v1466_v54 = vld [vmem:[#allocation5 + $0x38] sm:$0xff] }
 0x5a4   :  { %2267 = vmatmul.mubr.f32.gmra.mrb[16].mxu0 %v3393_v60  ;;  %v215_v60 = vadd.f32 %v3296_v30, %v3368_v50  ;;  %v3538_v50 = vld [vmem:[%s3696_s4 + $0x1] ss:$0 sm:$0xff] }
 0x5a5   :  { %2269 = vmatprep.mubr.f32.mxu0 %v3414_v2  ;;  %2819 = vmatpush3.bf16.msra.mxu0 %v3495_v39 }
 0x5a6   :  { %2820 = vmatprep.subr.bf16.mxu0 %v3121_v0 }
 0x5a8   :  { %2270 = vmatmul.mubr.f32.gmra.mrb[18].mxu0 %v3025_v13 }
 0x5a9   :  { %2822 = vmatpush3.bf16.msra.mxu0 %v3499_v42 }
 0x5aa   :  { %2823 = vmatprep.subr.bf16.mxu0 %v3121_v0 }
 0x5ad   :  { %2825 = vmatpush3.bf16.msra.mxu0 %v3503_v45 }
 0x5ae   :  { %2826 = vmatprep.subr.bf16.mxu0 %v3121_v0 }
 0x5b1   :  { %2828 = vmatpush3.bf16.msra.mxu0 %v3507_v48 }
 0x5b2   :  { %2829 = vmatprep.subr.bf16.mxu0 %v3121_v0 }
 0x5b5   :  { %2831 = vmatpush3.bf16.msra.mxu0 %v3511_v53 }
 0x5b6   :  { %2832 = vmatprep.subr.bf16.mxu0 %v3121_v0 }
 0x5b9   :  { %2834 = vmatpush3.bf16.msra.mxu0 %v3515_v56 }
 0x5ba   :  { %2835 = vmatprep.subr.bf16.mxu0 %v3121_v0 }
 0x5bd   :  { %2837 = vmatpush3.bf16.msra.mxu0 %v3519_v59 }
 0x5be   :  { %2862 = vmatprep.subr.bf16.mxu0 %v3121_v0 }
 0x653   :  { %v693_v61 = vpop.f32.mrb[12].mxu0 }
 0x654   :  { %v697_v62 = vadd.f32 %v693_v61, %v215_v60  ;;  %v2195_v63 = vpop.f32.mrb[13].mxu0 }
 0x656   :  { %3026 = vtanh.f32 %v697_v62 }
 0x660   :  { %v3027_v1 = vpop.eup %3026 }
 0x661   :  { %2229 = vmatmul.mubr.f32.vlgmr.msra.gmra.mrb[6].mxu1 %v3027_v1  ;;  %2272 = vmatprep.mubr.f32.mxu0 %v3027_v1  ;;  %v1469_v1 = vld [vmem:[#allocation5 + $0x50] sm:$0xff] }
 0x662   :  { %2792 = vmatpush3.bf16.msra.mxu1 %v3491_v36  ;;  %2307 = vmatprep.mubr.msk.f32.mxu1 %vm3122_vm2, %v3123_v27 }
 0x663   :  { %2793 = vmatprep.subr.bf16.mxu1 %v3121_v0 }
 0x666   :  { %2795 = vmatpush3.bf16.msra.mxu1 %v3495_v39 }
 0x667   :  { %2796 = vmatprep.subr.bf16.mxu1 %v3121_v0 }
 0x66a   :  { %2798 = vmatpush3.bf16.msra.mxu1 %v3499_v42 }
 0x66b   :  { %2799 = vmatprep.subr.bf16.mxu1 %v3121_v0 }
 0x66e   :  { %2801 = vmatpush3.bf16.msra.mxu1 %v3503_v45 }
 0x66f   :  { %2802 = vmatprep.subr.bf16.mxu1 %v3121_v0 }
 0x672   :  { %2804 = vmatpush3.bf16.msra.mxu1 %v3507_v48 }
 0x673   :  { %v2265_v2 = vpop.f32.mrb[14].mxu0  ;;  %2805 = vmatprep.subr.bf16.mxu1 %v3121_v0 }
 0x674   :  { %v873_v3 = vpop.f32.mrb[15].mxu0  ;;  %v879_v15 = vadd.f32 %v2265_v2, %v3538_v50  ;;  %v1470_v2 = vld [vmem:[#allocation5 + $0x58] sm:$0xff] }
 0x675   :  { %v874_v4 = vadd.f32 %v3538_v50, %v873_v3  ;;  %v2974_v3 = vpack.c.bf16 %v1470_v2, %v1469_v1 }
 0x676   :  { %2807 = vmatpush3.bf16.msra.mxu1 %v3511_v53 }
 0x677   :  { %3028 = vtanh.f32 %v874_v4  ;;  %v3544_v5 = vpop.f32.mrb[16].mxu0  ;;  %2808 = vmatprep.subr.bf16.mxu1 %v3121_v0  ;;  %v1471_v4 = vld [vmem:[#allocation5 + $0x60] sm:$0xff] }
 0x678   :  { %v883_v6 = vpop.f32.mrb[17].mxu0  ;;  %v889_v25 = vadd.f32 %v3544_v5, %v3538_v50  ;;  %v1472_v5 = vld [vmem:[#allocation5 + $0x68] sm:$0xff] }
 0x679   :  { %v884_v20 = vadd.f32 %v3538_v50, %v883_v6  ;;  %v2977_v6 = vpack.c.bf16 %v1472_v5, %v1471_v4 }
 0x67a   :  { %2810 = vmatpush3.bf16.msra.mxu1 %v3515_v56 }
 0x67b   :  { %v3548_v7 = vpop.f32.mrb[18].mxu0  ;;  %2811 = vmatprep.subr.bf16.mxu1 %v3121_v0 }
 0x67c   :  { %v3551_v8 = vpop.f32.mrb[19].mxu0 }
 0x67d   :  { %v894_v32 = vadd.f32 %v3538_v50, %v3551_v8  ;;  %v1474_v8 = vld [vmem:[#allocation5 + $0x78] sm:$0xff] }
 0x67e   :  { %2813 = vmatpush3.bf16.msra.mxu1 %v3519_v59 }
 0x67f   :  { %2838 = vmatprep.subr.bf16.mxu1 %v3121_v0 }
 0x681   :  { %v3029_v9 = vpop.eup %3028 }
 0x682   :  { %2308 = vmatmul.mubr.f32.vlgmr.msra.gmra.mrb[8].mxu1 %v3029_v9 }
 0x683   :  { %2840 = vmatpush3.bf16.msra.mxu1 %v3491_v36  ;;  %2377 = vmatprep.mubr.msk.f32.mxu1 %vm3122_vm2, %v3123_v27 }
 0x684   :  { %2841 = vmatprep.subr.bf16.mxu1 %v3121_v0 }
 0x687   :  { %2843 = vmatpush3.bf16.msra.mxu1 %v3495_v39 }
 0x688   :  { %2844 = vmatprep.subr.bf16.mxu1 %v3121_v0 }
 0x68b   :  { %2846 = vmatpush3.bf16.msra.mxu1 %v3499_v42 }
 0x68c   :  { %2847 = vmatprep.subr.bf16.mxu1 %v3121_v0 }
 0x68f   :  { %2849 = vmatpush3.bf16.msra.mxu1 %v3503_v45 }
 0x690   :  { %2850 = vmatprep.subr.bf16.mxu1 %v3121_v0 }
 0x693   :  { %2852 = vmatpush3.bf16.msra.mxu1 %v3507_v48 }
 0x694   :  { %2853 = vmatprep.subr.bf16.mxu1 %v3121_v0 }
 0x697   :  { %2855 = vmatpush3.bf16.msra.mxu1 %v3511_v53 }
 0x698   :  { %2856 = vmatprep.subr.bf16.mxu1 %v3121_v0 }
 0x69b   :  { %2858 = vmatpush3.bf16.msra.mxu1 %v3515_v56 }
 0x69c   :  { %2859 = vmatprep.subr.bf16.mxu1 %v3121_v0 }
 0x69f   :  { %2861 = vmatpush3.bf16.msra.mxu1 %v3519_v59 }
 0x6a0   :  { %2886 = vmatprep.subr.bf16.mxu1 %v3121_v0 }
 0x734   :  { %v768_v11 = vpop.f32.mrb[6].mxu1 }
 0x735   :  { %v772_v12 = vadd.f32 %v768_v11, %v220_v10  ;;  %v2230_v13 = vpop.f32.mrb[7].mxu1  ;;  %v1553_v10 = vld [vmem:[#allocation7] sm:$0xff]  ;;  %v1554_v11 = vld [vmem:[#allocation7 + $0x8] sm:$0xff] }
 0x736   :  { %v1556_v13 = vld [vmem:[#allocation7 + $0x18] sm:$0xff] }
 0x737   :  { %3030 = vtanh.f32 %v772_v12  ;;  %v1555_v12 = vld [vmem:[#allocation7 + $0x10] sm:$0xff] }
 0x741   :  { %v3031_v14 = vpop.eup %3030 }
 0x742   :  { %2273 = vmatmul.mubr.f32.gmra.mrb[20].mxu0 %v3031_v14  ;;  %v2986_v14 = vpack.c.bf16 %v1556_v13, %v1555_v12 }
 0x743   :  { %2342 = vmatprep.mubr.msk.f32.mxu0 %vm3122_vm2, %v3123_v27 }
 0x755   :  { %v1007_v16 = vpop.f32.mrb[8].mxu1 }
 0x756   :  { %v1011_v17 = vadd.f32 %v1007_v16, %v879_v15  ;;  %v2309_v18 = vpop.f32.mrb[9].mxu1  ;;  %v1557_v15 = vld [vmem:[#allocation7 + $0x20] sm:$0xff]  ;;  %v1558_v16 = vld [vmem:[#allocation7 + $0x28] sm:$0xff] }
 0x757   :  { %v1559_v18 = vld [vmem:[#allocation7 + $0x30] sm:$0xff] }
 0x758   :  { %3032 = vtanh.f32 %v1011_v17  ;;  %v2989_v17 = vpack.c.bf16 %v1558_v16, %v1557_v15 }
 0x762   :  { %v3033_v19 = vpop.eup %3032 }
 0x763   :  { %2343 = vmatmul.mubr.f32.vlgmr.msra.gmra.mrb[22].mxu0 %v3033_v19  ;;  %v1560_v19 = vld [vmem:[#allocation7 + $0x38] sm:$0xff] }
 0x764   :  { %2864 = vmatpush3.bf16.msra.mxu0 %v3491_v36  ;;  %2412 = vmatprep.mubr.msk.f32.mxu0 %vm3122_vm2, %v3123_v27 }
 0x765   :  { %2865 = vmatprep.subr.bf16.mxu0 %v3121_v0 }
 0x768   :  { %2867 = vmatpush3.bf16.msra.mxu0 %v3495_v39 }
 0x769   :  { %2868 = vmatprep.subr.bf16.mxu0 %v3121_v0 }
 0x76c   :  { %2870 = vmatpush3.bf16.msra.mxu0 %v3499_v42 }
 0x76d   :  { %2871 = vmatprep.subr.bf16.mxu0 %v3121_v0 }
 0x770   :  { %2873 = vmatpush3.bf16.msra.mxu0 %v3503_v45 }
 0x771   :  { %2874 = vmatprep.subr.bf16.mxu0 %v3121_v0 }
 0x774   :  { %2876 = vmatpush3.bf16.msra.mxu0 %v3507_v48 }
 0x775   :  { %2877 = vmatprep.subr.bf16.mxu0 %v3121_v0 }
 0x778   :  { %2879 = vmatpush3.bf16.msra.mxu0 %v3511_v53 }
 0x779   :  { %2880 = vmatprep.subr.bf16.mxu0 %v3121_v0 }
 0x77c   :  { %2882 = vmatpush3.bf16.msra.mxu0 %v3515_v56 }
 0x77d   :  { %2883 = vmatprep.subr.bf16.mxu0 %v3121_v0 }
 0x780   :  { %2885 = vmatpush3.bf16.msra.mxu0 %v3519_v59 }
 0x781   :  { %2910 = vmatprep.subr.bf16.mxu0 %v3121_v0 }
 0x815   :  { %v3596_v30 = vpop.f32.mrb[20].mxu0 }
 0x816   :  { %v3598_v49 = vpop.f32.mrb[21].mxu0 }
 0x836   :  { %v1081_v21 = vpop.f32.mrb[22].mxu0 }
 0x837   :  { %v1085_v22 = vadd.f32 %v1081_v21, %v884_v20  ;;  %v2344_v23 = vpop.f32.mrb[23].mxu0  ;;  %v1561_v20 = vld [vmem:[#allocation7 + $0x40] sm:$0xff]  ;;  %v1562_v21 = vld [vmem:[#allocation7 + $0x48] sm:$0xff] }
 0x838   :  { %v1563_v23 = vld [vmem:[#allocation7 + $0x50] sm:$0xff] }
 0x839   :  { %3034 = vtanh.f32 %v1085_v22  ;;  %v2995_v22 = vpack.c.bf16 %v1562_v21, %v1561_v20 }
 0x843   :  { %v3035_v24 = vpop.eup %3034 }
 0x844   :  { %2378 = vmatmul.mubr.f32.vlgmr.msra.gmra.mrb[10].mxu1 %v3035_v24  ;;  %v1564_v24 = vld [vmem:[#allocation7 + $0x58] sm:$0xff] }
 0x845   :  { %2888 = vmatpush3.bf16.msra.mxu1 %v3491_v36  ;;  %2447 = vmatprep.mubr.msk.f32.mxu1 %vm3122_vm2, %v3123_v27 }
 0x846   :  { %2889 = vmatprep.subr.bf16.mxu1 %v3121_v0 }
 0x849   :  { %2891 = vmatpush3.bf16.msra.mxu1 %v3495_v39 }
 0x84a   :  { %2892 = vmatprep.subr.bf16.mxu1 %v3121_v0 }
 0x84d   :  { %2894 = vmatpush3.bf16.msra.mxu1 %v3499_v42 }
 0x84e   :  { %2895 = vmatprep.subr.bf16.mxu1 %v3121_v0 }
 0x851   :  { %2897 = vmatpush3.bf16.msra.mxu1 %v3503_v45 }
 0x852   :  { %2898 = vmatprep.subr.bf16.mxu1 %v3121_v0 }
 0x855   :  { %2900 = vmatpush3.bf16.msra.mxu1 %v3507_v48 }
 0x856   :  { %2901 = vmatprep.subr.bf16.mxu1 %v3121_v0 }
 0x859   :  { %2903 = vmatpush3.bf16.msra.mxu1 %v3511_v53 }
 0x85a   :  { %2904 = vmatprep.subr.bf16.mxu1 %v3121_v0 }
 0x85d   :  { %2906 = vmatpush3.bf16.msra.mxu1 %v3515_v56 }
 0x85e   :  { %2907 = vmatprep.subr.bf16.mxu1 %v3121_v0 }
 0x861   :  { %2909 = vmatpush3.bf16.msra.mxu1 %v3519_v59 }
 0x862   :  { %2934 = vmatprep.subr.bf16.mxu1 %v3121_v0 }
 0x917   :  { %v1155_v26 = vpop.f32.mrb[10].mxu1 }
 0x918   :  { %v1159_v28 = vadd.f32 %v1155_v26, %v889_v25  ;;  %v2379_v29 = vpop.f32.mrb[11].mxu1  ;;  %v2998_v25 = vpack.c.bf16 %v1564_v24, %v1563_v23  ;;  %v1565_v26 = vld [vmem:[#allocation7 + $0x60] sm:$0xff] }
 0x91a   :  { %3036 = vtanh.f32 %v1159_v28  ;;  %v1566_v28 = vld [vmem:[#allocation7 + $0x68] sm:$0xff] }
 0x91b   :  { %v3001_v29 = vpack.c.bf16 %v1566_v28, %v1565_v26 }
 0x924   :  { %v3037_v31 = vpop.eup %3036 }
 0x925   :  { %2413 = vmatmul.mubr.f32.vlgmr.msra.gmra.mrb[24].mxu0 %v3037_v31  ;;  %v909_v31 = vadd.f32 %v3596_v30, %v3538_v50 }
 0x926   :  { %2912 = vmatpush3.bf16.msra.mxu0 %v3491_v36  ;;  %2482 = vmatprep.mubr.msk.f32.mxu0 %vm3122_vm2, %v3123_v27 }
 0x927   :  { %2913 = vmatprep.subr.bf16.mxu0 %v3121_v0 }
 0x92a   :  { %2915 = vmatpush3.bf16.msra.mxu0 %v3495_v39 }
 0x92b   :  { %2916 = vmatprep.subr.bf16.mxu0 %v3121_v0 }
 0x92e   :  { %2918 = vmatpush3.bf16.msra.mxu0 %v3499_v42 }
 0x92f   :  { %2919 = vmatprep.subr.bf16.mxu0 %v3121_v0 }
 0x932   :  { %2921 = vmatpush3.bf16.msra.mxu0 %v3503_v45 }
 0x933   :  { %2922 = vmatprep.subr.bf16.mxu0 %v3121_v0 }
 0x936   :  { %2924 = vmatpush3.bf16.msra.mxu0 %v3507_v48 }
 0x937   :  { %2925 = vmatprep.subr.bf16.mxu0 %v3121_v0 }
 0x93a   :  { %2927 = vmatpush3.bf16.msra.mxu0 %v3511_v53 }
 0x93b   :  { %2928 = vmatprep.subr.bf16.mxu0 %v3121_v0 }
 0x93e   :  { %2930 = vmatpush3.bf16.msra.mxu0 %v3515_v56 }
 0x93f   :  { %2931 = vmatprep.subr.bf16.mxu0 %v3121_v0 }
 0x942   :  { %2933 = vmatpush3.bf16.msra.mxu0 %v3519_v59 }
 0x943   :  { %2958 = vmatprep.subr.bf16.mxu0 %v3121_v0 }
 0x9f8   :  { %v1229_v33 = vpop.f32.mrb[24].mxu0 }
 0x9f9   :  { %v1233_v34 = vadd.f32 %v1229_v33, %v894_v32  ;;  %v2414_v35 = vpop.f32.mrb[25].mxu0 }
 0x9fb   :  { %3038 = vtanh.f32 %v1233_v34 }
 0xa05   :  { %v3039_v37 = vpop.eup %3038 }
 0xa06   :  { %2448 = vmatmul.mubr.f32.vlgmr.msra.gmra.mrb[12].mxu1 %v3039_v37  ;;  %v1567_v37 = vld [vmem:[#allocation7 + $0x70] sm:$0xff] }
 0xa07   :  { %2936 = vmatpush3.bf16.msra.mxu1 %v3491_v36  ;;  %2517 = vmatprep.mubr.msk.f32.mxu1 %vm3122_vm2, %v3123_v27  ;;  %v899_v36 = vadd.f32 %v3548_v7, %v3538_v50  ;;  %v1473_v7 = vld [vmem:[#allocation5 + $0x70] sm:$0xff] }
 0xa08   :  { %2937 = vmatprep.subr.bf16.mxu1 %v3121_v0  ;;  %v2980_v9 = vpack.c.bf16 %v1474_v8, %v1473_v7 }
 0xa0b   :  { %2939 = vmatpush3.bf16.msra.mxu1 %v3495_v39 }
 0xa0c   :  { %2940 = vmatprep.subr.bf16.mxu1 %v3121_v0 }
 0xa0f   :  { %2942 = vmatpush3.bf16.msra.mxu1 %v3499_v42  ;;  %v1459_v42 = vld [vmem:[#allocation5] sm:$0xff] }
 0xa10   :  { %2943 = vmatprep.subr.bf16.mxu1 %v3121_v0 }
 0xa13   :  { %2945 = vmatpush3.bf16.msra.mxu1 %v3503_v45  ;;  %v2959_v45 = vpack.c.bf16 %v1460_v43, %v1459_v42 }
 0xa14   :  { %2946 = vmatprep.subr.bf16.mxu1 %v3121_v0 }
 0xa17   :  { %2948 = vmatpush3.bf16.msra.mxu1 %v3507_v48  ;;  %v1463_v48 = vld [vmem:[#allocation5 + $0x20] sm:$0xff] }
 0xa18   :  { %2949 = vmatprep.subr.bf16.mxu1 %v3121_v0  ;;  %v2965_v52 = vpack.c.bf16 %v1464_v51, %v1463_v48 }
 0xa1b   :  { %2951 = vmatpush3.bf16.msra.mxu1 %v3511_v53  ;;  %v1465_v53 = vld [vmem:[#allocation5 + $0x30] sm:$0xff] }
 0xa1c   :  { %2952 = vmatprep.subr.bf16.mxu1 %v3121_v0  ;;  %v2968_v55 = vpack.c.bf16 %v1466_v54, %v1465_v53 }
 0xa1f   :  { %2954 = vmatpush3.bf16.msra.mxu1 %v3515_v56  ;;  %v1467_v56 = vld [vmem:[#allocation5 + $0x40] sm:$0xff] }
 0xa20   :  { %2955 = vmatprep.subr.bf16.mxu1 %v3121_v0  ;;  %v2971_v58 = vpack.c.bf16 %v1468_v57, %v1467_v56 }
 0xa23   :  { %2957 = vmatpush3.bf16.msra.mxu1 %v3519_v59  ;;  %v904_v59 = vadd.f32 %v3538_v50, %v3598_v49  ;;  %v2992_v49 = vpack.c.bf16 %v1560_v19, %v1559_v18  ;;  %v1666_v50 = vld [vmem:[%s3700_s8] ss:$0 sm:$0xff] }
 0xa24   :  { %2982 = vmatprep.subr.bf16.mxu1 %v3121_v0 }
 0xad9   :  { %v1303_v38 = vpop.f32.mrb[12].mxu1 }
 0xada   :  { %v1307_v39 = vadd.f32 %v1303_v38, %v899_v36  ;;  %v2449_v40 = vpop.f32.mrb[13].mxu1  ;;  %v1568_v36 = vld [vmem:[#allocation7 + $0x78] sm:$0xff] }
 0xadb   :  { %v3004_v38 = vpack.c.bf16 %v1568_v36, %v1567_v37 }
 0xadc   :  { %3040 = vtanh.f32 %v1307_v39  ;;  %v1665_v39 = vld [vmem:[%s3698_s6] ss:$0 sm:$0xff] }
 0xae6   :  { %v3041_v41 = vpop.eup %3040 }
 0xae7   :  { %2483 = vmatmul.mubr.f32.vlgmr.msra.gmra.mrb[26].mxu0 %v3041_v41 }
 0xae8   :  { %2552 = vmatprep.mubr.msk.f32.mxu0 %vm3122_vm2, %v3123_v27  ;;  %2960 = vmatpush3.bf16.msra.mxu0 %v2959_v45 }
 0xae9   :  { %2961 = vmatprep.subr.bf16.mxu0 %v3121_v0 }
 0xaec   :  { %2963 = vmatpush3.bf16.msra.mxu0 %v2962_v47 }
 0xaed   :  { %2964 = vmatprep.subr.bf16.mxu0 %v3121_v0 }
 0xaf0   :  { %2966 = vmatpush3.bf16.msra.mxu0 %v2965_v52 }
 0xaf1   :  { %2967 = vmatprep.subr.bf16.mxu0 %v3121_v0 }
 0xaf4   :  { %2969 = vmatpush3.bf16.msra.mxu0 %v2968_v55 }
 0xaf5   :  { %2970 = vmatprep.subr.bf16.mxu0 %v3121_v0 }
 0xaf8   :  { %2972 = vmatpush3.bf16.msra.mxu0 %v2971_v58 }
 0xaf9   :  { %2973 = vmatprep.subr.bf16.mxu0 %v3121_v0 }
 0xafc   :  { %2975 = vmatpush3.bf16.msra.mxu0 %v2974_v3 }
 0xafd   :  { %2976 = vmatprep.subr.bf16.mxu0 %v3121_v0 }
 0xb00   :  { %2978 = vmatpush3.bf16.msra.mxu0 %v2977_v6 }
 0xb01   :  { %2979 = vmatprep.subr.bf16.mxu0 %v3121_v0 }
 0xb04   :  { %2981 = vmatpush3.bf16.msra.mxu0 %v2980_v9 }
 0xbba   :  { %v1377_v60 = vpop.f32.mrb[26].mxu0 }
 0xbbb   :  { %v1381_v61 = vadd.f32 %v1377_v60, %v904_v59  ;;  %v2484_v62 = vpop.f32.mrb[27].mxu0 }
 0xbbd   :  { %3042 = vtanh.f32 %v1381_v61 }
 0xbc7   :  { %v3043_v63 = vpop.eup %3042 }
 0xbc8   :  { %2518 = vmatmul.mubr.f32.vlgmr.msra.gmra.mrb[14].mxu1 %v3043_v63 }
 0xbc9   :  { %2587 = vmatprep.mubr.msk.f32.mxu1 %vm3122_vm2, %v3123_v27  ;;  %v2983_v27 = vpack.c.bf16 %v1554_v11, %v1553_v10 }
 0xbcb   :  { %2984 = vmatpush3.bf16.msra.mxu1 %v2983_v27 }
 0xbcc   :  { %2985 = vmatprep.subr.bf16.mxu1 %v3121_v0 }
 0xbcf   :  { %2987 = vmatpush3.bf16.msra.mxu1 %v2986_v14 }
 0xbd0   :  { %2988 = vmatprep.subr.bf16.mxu1 %v3121_v0 }
 0xbd3   :  { %2990 = vmatpush3.bf16.msra.mxu1 %v2989_v17 }
 0xbd4   :  { %2991 = vmatprep.subr.bf16.mxu1 %v3121_v0 }
 0xbd7   :  { %2993 = vmatpush3.bf16.msra.mxu1 %v2992_v49 }
 0xbd8   :  { %2994 = vmatprep.subr.bf16.mxu1 %v3121_v0 }
 0xbdb   :  { %2996 = vmatpush3.bf16.msra.mxu1 %v2995_v22 }
 0xbdc   :  { %2997 = vmatprep.subr.bf16.mxu1 %v3121_v0 }
 0xbdf   :  { %2999 = vmatpush3.bf16.msra.mxu1 %v2998_v25 }
 0xbe0   :  { %3000 = vmatprep.subr.bf16.mxu1 %v3121_v0 }
 0xbe3   :  { %3002 = vmatpush3.bf16.msra.mxu1 %v3001_v29 }
 0xbe4   :  { %3003 = vmatprep.subr.bf16.mxu1 %v3121_v0 }
 0xbe7   :  { %3005 = vmatpush3.bf16.msra.mxu1 %v3004_v38 }
 0xc9b   :  { %v1451_v32 = vpop.f32.mrb[14].mxu1 }
 0xc9c   :  { %v1455_v33 = vadd.f32 %v1451_v32, %v909_v31  ;;  %v2519_v34 = vpop.f32.mrb[15].mxu1 }
 0xc9e   :  { %3044 = vtanh.f32 %v1455_v33 }
 0xca8   :  { %v3045_v35 = vpop.eup %3044 }
 0xca9   :  { %2553 = vmatmul.mubr.f32.vlgmr.msra.gmra.mrb[28].mxu0 %v3045_v35 }
 0xd7c   :  { %v1548_v40 = vpop.f32.mrb[28].mxu0 }
 0xd7d   :  { %v1549_v41 = vadd.f32 %v1665_v39, %v1548_v40  ;;  %v2554_v0 = vpop.f32.mrb[29].mxu0 }
 0xd7f   :  { %v1552_v42 = vmax.f32 %v1549_v41, 0.0 }
 0xd81   :  { %2588 = vmatmul.mubr.f32.vlgmr.msra.gmra.mrb[16].mxu1 %v1552_v42 }
 0xe54   :  { %v1642_v30 = vpop.f32.mrb[16].mxu1 }
 0xe55   :  { %v1643_v43 = vadd.f32 %v1666_v50, %v1642_v30  ;;  %v2589_v44 = vpop.f32.mrb[17].mxu1 }
 0xe57   :  { %1646 = vst [vmem:[%s3701_s9] sm:$0xff] %v1643_v43 }
 0xe58   :  { %1651 = vsyncpa [#allocation4], 1 }
 0xe59   :  { %1652 = vsyncpa [#allocation6], 1 }

</bundles_post_ra>
